<compile_context>
chip_gen: v5e
topology: v5e:2x2
jax: 0.10.0
libtpu: 0.0.40
codegen_flags: <defaults>
</compile_context>

<pallas_src>
import functools
import math

import jax
import jax.numpy as jnp
from jax.experimental import pallas as pl
from jax.experimental.pallas import tpu as pltpu

LN_EPS = 1e-5     # PyTorch LayerNorm default eps
NEG_INF = -1e30   # additive key-padding mask value (kept in f32)


def _layernorm(x, w, b):
    mu = jnp.mean(x, axis=-1, keepdims=True)
    var = jnp.mean(jnp.square(x - mu), axis=-1, keepdims=True)
    return (x - mu) * jax.lax.rsqrt(var + LN_EPS) * w + b


def _block_kernel(n_head,
                  x_ref, pos_ref, mask_ref,
                  ln1_w_ref, ln1_b_ref,
                  wqk_ref, bqk_ref, wv_ref, bv_ref, wo_ref, bo_ref,
                  ln2_w_ref, ln2_b_ref,
                  wfc_ref, bfc_ref, wproj_ref, bproj_ref,
                  x_out_ref, x_norm_ref):
    """One ResidualAttentionBlock_Step for a block of batch elements."""
    x = x_ref[...]                                   # (Bb, S, W) f32
    Bb, S, W = x.shape
    H = n_head
    Dh = W // H
    M = Bb * S

    # ---- ln_1 (f32) ----
    xn = _layernorm(x, ln1_w_ref[...], ln1_b_ref[...])            # (Bb, S, W)

    # ---- projections, batch folded into M ----
    qk_in = (xn + pos_ref[...]).reshape(M, W).astype(jnp.bfloat16)   # q = k = xn + pos
    xn2d = xn.reshape(M, W).astype(jnp.bfloat16)                     # v uses xn only

    qk = jnp.dot(qk_in, wqk_ref[...],
                 preferred_element_type=jnp.float32) + bqk_ref[...]  # (M, 2W)
    v = jnp.dot(xn2d, wv_ref[...],
                preferred_element_type=jnp.float32) + bv_ref[...]    # (M, W)

    q3 = qk[:, :W].reshape(Bb, S, W).astype(jnp.bfloat16)   # scale baked into wqk/bqk
    k3 = qk[:, W:].reshape(Bb, S, W).astype(jnp.bfloat16)
    v3 = v.reshape(Bb, S, W).astype(jnp.bfloat16)

    mask_add = mask_ref[...]                                 # (Bb, 1, S) f32 additive

    # Static per-head loop; each head's matmuls are batched over the Bb batch
    # elements of this grid step.  Softmax stays in f32.
    head_outs = []
    for h in range(H):
        sl = slice(h * Dh, (h + 1) * Dh)
        s = jnp.einsum('bqd,bkd->bqk', q3[:, :, sl], k3[:, :, sl],
                       preferred_element_type=jnp.float32)           # (Bb, S, S)
        s = s + mask_add
        s = s - jnp.max(s, axis=-1, keepdims=True)
        p = jnp.exp(s)
        p = p * pl.reciprocal(jnp.sum(p, axis=-1, keepdims=True), approx=True)
        head_outs.append(
            jnp.einsum('bqk,bkd->bqd', p.astype(jnp.bfloat16), v3[:, :, sl],
                       preferred_element_type=jnp.float32))          # (Bb, S, Dh)
    attn = jnp.concatenate(head_outs, axis=-1).reshape(M, W)         # (M, W) f32

    attn = jnp.dot(attn.astype(jnp.bfloat16), wo_ref[...],
                   preferred_element_type=jnp.float32) + bo_ref[...]
    x1 = x + attn.reshape(Bb, S, W)                                  # residual 1

    # ---- ln_2 + MLP (c_fc -> QuickGELU -> c_proj) ----
    xn2 = _layernorm(x1, ln2_w_ref[...], ln2_b_ref[...])
    hdn = jnp.dot(xn2.reshape(M, W).astype(jnp.bfloat16), wfc_ref[...],
                  preferred_element_type=jnp.float32) + bfc_ref[...]  # (M, 4W)
    hdn = hdn * jax.nn.sigmoid(1.702 * hdn)                           # QuickGELU (f32)
    hdn = jnp.dot(hdn.astype(jnp.bfloat16), wproj_ref[...],
                  preferred_element_type=jnp.float32) + bproj_ref[...]
    x2 = x1 + hdn.reshape(Bb, S, W)                                   # residual 2

    x_out_ref[...] = x2
    x_norm_ref[...] = xn


def prepare_params(raw, n_head):
    """PyTorch-layout parameters -> kernel layout (pre-transposed, fused QK,
    1/sqrt(Dh) baked into Q, matmul weights in bf16, LN/bias in f32)."""
    (ln1_w, ln1_b, in_w, in_b, out_w, out_b,
     ln2_w, ln2_b, fc_w, fc_b, proj_w, proj_b) = raw
    W = ln1_w.shape[-1]
    Dh = W // n_head
    scale = 1.0 / math.sqrt(Dh)

    wq_t = in_w[:W, :].T * scale           # (W, W)
    wk_t = in_w[W:2 * W, :].T              # (W, W)
    wv_t = in_w[2 * W:, :].T               # (W, W)
    bq = in_b[:W] * scale
    bk = in_b[W:2 * W]
    bv = in_b[2 * W:]

    f32, bf16 = jnp.float32, jnp.bfloat16
    return (
        ln1_w.reshape(1, W).astype(f32), ln1_b.reshape(1, W).astype(f32),
        jnp.concatenate([wq_t, wk_t], axis=1).astype(bf16),        # (W, 2W)
        jnp.concatenate([bq, bk]).reshape(1, 2 * W).astype(f32),   # (1, 2W)
        wv_t.astype(bf16), bv.reshape(1, W).astype(f32),
        out_w.T.astype(bf16), out_b.reshape(1, W).astype(f32),
        ln2_w.reshape(1, W).astype(f32), ln2_b.reshape(1, W).astype(f32),
        fc_w.T.astype(bf16), fc_b.reshape(1, 4 * W).astype(f32),   # (W, 4W)
        proj_w.T.astype(bf16), proj_b.reshape(1, W).astype(f32),   # (4W, W)
    )


def _choose_block_b(B, S):
    # Aim for >= 256 rows per matmul (fills the v6e/v7x MXU tile; >=128 on v5e)
    # while keeping block_b a divisor of B so every grid step is full.
    bb = min(B, max(1, 256 // S))
    while B % bb:
        bb -= 1
    return bb


def residual_attention_block_step(x_sbw, prepared_params, n_head,
                                  key_padding_mask=None, pos_sbw=None,
                                  block_b=None):
    """Forward of ResidualAttentionBlock_Step.

    x_sbw, pos_sbw: (S, B, W) (PyTorch nn.MultiheadAttention default layout).
    key_padding_mask: (B, S) bool, True = key position is padding.
    Returns (x_out, x_norm), both (S, B, W).
    """
    S, B, W = x_sbw.shape
    if block_b is None:
        block_b = _choose_block_b(B, S)
    assert B % block_b == 0

    x = jnp.transpose(x_sbw, (1, 0, 2)).astype(jnp.float32)        # (B, S, W)
    if pos_sbw is None:
        pos = jnp.zeros_like(x)
    else:
        pos = jnp.transpose(pos_sbw, (1, 0, 2)).astype(jnp.float32)
    if key_padding_mask is None:
        mask = jnp.zeros((B, 1, S), jnp.float32)
    else:
        mask = jnp.where(key_padding_mask, NEG_INF, 0.0).astype(jnp.float32).reshape(B, 1, S)

    def const2d(shape):
        return pl.BlockSpec(shape, lambda b: (0, 0))

    in_specs = [
        pl.BlockSpec((block_b, S, W), lambda b: (b, 0, 0)),   # x
        pl.BlockSpec((block_b, S, W), lambda b: (b, 0, 0)),   # pos
        pl.BlockSpec((block_b, 1, S), lambda b: (b, 0, 0)),   # additive key mask
        const2d((1, W)), const2d((1, W)),                     # ln_1 weight / bias
        const2d((W, 2 * W)), const2d((1, 2 * W)),             # fused QK proj (pre-T, scaled)
        const2d((W, W)), const2d((1, W)),                     # V proj (pre-T)
        const2d((W, W)), const2d((1, W)),                     # out proj (pre-T)
        const2d((1, W)), const2d((1, W)),                     # ln_2 weight / bias
        const2d((W, 4 * W)), const2d((1, 4 * W)),             # mlp c_fc (pre-T)
        const2d((4 * W, W)), const2d((1, W)),                 # mlp c_proj (pre-T)
    ]
    out_specs = (
        pl.BlockSpec((block_b, S, W), lambda b: (b, 0, 0)),
        pl.BlockSpec((block_b, S, W), lambda b: (b, 0, 0)),
    )
    out_shape = (
        jax.ShapeDtypeStruct((B, S, W), jnp.float32),
        jax.ShapeDtypeStruct((B, S, W), jnp.float32),
    )
    kernel = functools.partial(_block_kernel, n_head)
    # TODO(synk): for production widths (W >= ~768) on v7x (64 MiB VMEM),
    # single-buffer / stream the large weights (in_proj, c_fc, c_proj) from HBM
    # with a K-tiled manual DMA loop instead of keeping them fully resident.
    x_out, x_norm = pl.pallas_call(
        kernel,
        grid=(B // block_b,),
        in_specs=in_specs,
        out_specs=out_specs,
        out_shape=out_shape,
        compiler_params=pltpu.CompilerParams(
            dimension_semantics=("parallel",),
            vmem_limit_bytes=32 * 1024 * 1024,
        ),
    )(x, pos, mask, *prepared_params)
    return (jnp.transpose(x_out, (1, 0, 2)), jnp.transpose(x_norm, (1, 0, 2)))


def init_params(key, width):
    """Deterministic synthetic parameters in the PyTorch module layout."""
    W = width
    k0, k1, k2, k3, k4 = jax.random.split(key, 5)
    s = 1.0 / math.sqrt(W)
    return (
        jnp.ones((W,), jnp.float32),                               # ln_1.weight
        jnp.zeros((W,), jnp.float32),                              # ln_1.bias
        jax.random.normal(k0, (3 * W, W), jnp.float32) * s,        # attn.in_proj_weight
        jax.random.normal(k1, (3 * W,), jnp.float32) * 0.02,       # attn.in_proj_bias
        jax.random.normal(k2, (W, W), jnp.float32) * s,            # attn.out_proj.weight
        jnp.zeros((W,), jnp.float32),                              # attn.out_proj.bias
        jnp.ones((W,), jnp.float32),                               # ln_2.weight
        jnp.zeros((W,), jnp.float32),                              # ln_2.bias
        jax.random.normal(k3, (4 * W, W), jnp.float32) * s,        # mlp.c_fc.weight
        jnp.zeros((4 * W,), jnp.float32),                          # mlp.c_fc.bias
        jax.random.normal(k4, (W, 4 * W), jnp.float32) * (1.0 / math.sqrt(4 * W)),  # mlp.c_proj.weight
        jnp.zeros((W,), jnp.float32),                              # mlp.c_proj.bias
    )


if __name__ == "__main__":
    # Small shapes consistent with the module: seq=8, batch=2, width=32, heads=4.
    S, B, W, HEADS = 8, 2, 32, 4

    key = jax.random.PRNGKey(0)
    kx, kp, kpos = jax.random.split(key, 3)
    x = jax.random.normal(kx, (S, B, W), jnp.float32)          # (seq, batch, width)
    pos = jax.random.normal(kpos, (S, B, W), jnp.float32) * 0.1
    key_padding_mask = jnp.zeros((B, S), bool).at[1, 6:].set(True)   # pad last 2 keys of batch 1

    raw_params = init_params(kp, W)
    prepared = prepare_params(raw_params, HEADS)

    x_out, x_norm = residual_attention_block_step(
        x, prepared, HEADS, key_padding_mask=key_padding_mask, pos_sbw=pos)
    x_out = jax.block_until_ready(x_out)
    x_norm = jax.block_until_ready(x_norm)

    assert x_out.shape == (S, B, W) and x_norm.shape == (S, B, W)
    assert bool(jnp.isfinite(x_out).all()) and bool(jnp.isfinite(x_norm).all())
    print("KERNEL_OK")
</pallas_src>

<mosaic_0001>
module attributes {stable_mosaic.version = 11 : i64} {
  func.func @_block_kernel(%arg0: i32, %arg1: memref<2x8x32xf32, #tpu.memory_space<vmem>>, %arg2: memref<2x8x32xf32, #tpu.memory_space<vmem>>, %arg3: memref<2x1x8xf32, #tpu.memory_space<vmem>>, %arg4: memref<1x32xf32, #tpu.memory_space<vmem>>, %arg5: memref<1x32xf32, #tpu.memory_space<vmem>>, %arg6: memref<32x64xbf16, #tpu.memory_space<vmem>>, %arg7: memref<1x64xf32, #tpu.memory_space<vmem>>, %arg8: memref<32x32xbf16, #tpu.memory_space<vmem>>, %arg9: memref<1x32xf32, #tpu.memory_space<vmem>>, %arg10: memref<32x32xbf16, #tpu.memory_space<vmem>>, %arg11: memref<1x32xf32, #tpu.memory_space<vmem>>, %arg12: memref<1x32xf32, #tpu.memory_space<vmem>>, %arg13: memref<1x32xf32, #tpu.memory_space<vmem>>, %arg14: memref<32x128xbf16, #tpu.memory_space<vmem>>, %arg15: memref<1x128xf32, #tpu.memory_space<vmem>>, %arg16: memref<128x32xbf16, #tpu.memory_space<vmem>>, %arg17: memref<1x32xf32, #tpu.memory_space<vmem>>, %arg18: memref<2x8x32xf32, #tpu.memory_space<vmem>>, %arg19: memref<2x8x32xf32, #tpu.memory_space<vmem>>) attributes {dimension_semantics = [#tpu.dimension_semantics<parallel>], iteration_bounds = array<i64: 1>, scalar_prefetch = 0 : i64, scratch_operands = 0 : i64, tpu.core_type = #tpu.core_type<tc>, window_params = [{transform_indices = @transform_0, window_bounds = array<i64: 2, 8, 32>}, {transform_indices = @transform_1, window_bounds = array<i64: 2, 8, 32>}, {transform_indices = @transform_2, window_bounds = array<i64: 2, 1, 8>}, {pipeline_mode = #tpu.pipeline_mode<synchronous>, transform_indices = @transform_3, window_bounds = array<i64: 1, 32>}, {pipeline_mode = #tpu.pipeline_mode<synchronous>, transform_indices = @transform_4, window_bounds = array<i64: 1, 32>}, {pipeline_mode = #tpu.pipeline_mode<synchronous>, transform_indices = @transform_5, window_bounds = array<i64: 32, 64>}, {pipeline_mode = #tpu.pipeline_mode<synchronous>, transform_indices = @transform_6, window_bounds = array<i64: 1, 64>}, {pipeline_mode = #tpu.pipeline_mode<synchronous>, transform_indices = @transform_7, window_bounds = array<i64: 32, 32>}, {pipeline_mode = #tpu.pipeline_mode<synchronous>, transform_indices = @transform_8, window_bounds = array<i64: 1, 32>}, {pipeline_mode = #tpu.pipeline_mode<synchronous>, transform_indices = @transform_9, window_bounds = array<i64: 32, 32>}, {pipeline_mode = #tpu.pipeline_mode<synchronous>, transform_indices = @transform_10, window_bounds = array<i64: 1, 32>}, {pipeline_mode = #tpu.pipeline_mode<synchronous>, transform_indices = @transform_11, window_bounds = array<i64: 1, 32>}, {pipeline_mode = #tpu.pipeline_mode<synchronous>, transform_indices = @transform_12, window_bounds = array<i64: 1, 32>}, {pipeline_mode = #tpu.pipeline_mode<synchronous>, transform_indices = @transform_13, window_bounds = array<i64: 32, 128>}, {pipeline_mode = #tpu.pipeline_mode<synchronous>, transform_indices = @transform_14, window_bounds = array<i64: 1, 128>}, {pipeline_mode = #tpu.pipeline_mode<synchronous>, transform_indices = @transform_15, window_bounds = array<i64: 128, 32>}, {pipeline_mode = #tpu.pipeline_mode<synchronous>, transform_indices = @transform_16, window_bounds = array<i64: 1, 32>}, {transform_indices = @transform_17, window_bounds = array<i64: 2, 8, 32>}, {transform_indices = @transform_18, window_bounds = array<i64: 2, 8, 32>}]} {
    %c0 = arith.constant 0 : index
    %c0_0 = arith.constant 0 : index
    %c0_1 = arith.constant 0 : index
    %0 = vector.load %arg1[%c0, %c0_0, %c0_1] : memref<2x8x32xf32, #tpu.memory_space<vmem>>, vector<2x8x32xf32>
    %c0_2 = arith.constant 0 : index
    %c0_3 = arith.constant 0 : index
    %1 = vector.load %arg4[%c0_2, %c0_3] : memref<1x32xf32, #tpu.memory_space<vmem>>, vector<1x32xf32>
    %c0_4 = arith.constant 0 : index
    %c0_5 = arith.constant 0 : index
    %2 = vector.load %arg5[%c0_4, %c0_5] : memref<1x32xf32, #tpu.memory_space<vmem>>, vector<1x32xf32>
    %cst = arith.constant dense<0.000000e+00> : vector<2x8xf32>
    %3 = vector.multi_reduction <add>, %0, %cst [2] : vector<2x8x32xf32> to vector<2x8xf32>
    %4 = vector.shape_cast %3 : vector<2x8xf32> to vector<2x8x1xf32>
    %cst_6 = arith.constant 3.200000e+01 : f32
    %5 = vector.broadcast %cst_6 : f32 to vector<2x8x1xf32>
    %6 = arith.divf %4, %5 : vector<2x8x1xf32>
    %7 = vector.broadcast %6 : vector<2x8x1xf32> to vector<2x8x32xf32>
    %8 = arith.subf %0, %7 : vector<2x8x32xf32>
    %9 = arith.mulf %8, %8 : vector<2x8x32xf32>
    %cst_7 = arith.constant dense<0.000000e+00> : vector<2x8xf32>
    %10 = vector.multi_reduction <add>, %9, %cst_7 [2] : vector<2x8x32xf32> to vector<2x8xf32>
    %11 = vector.shape_cast %10 : vector<2x8xf32> to vector<2x8x1xf32>
    %cst_8 = arith.constant 3.200000e+01 : f32
    %12 = vector.broadcast %cst_8 : f32 to vector<2x8x1xf32>
    %13 = arith.divf %11, %12 : vector<2x8x1xf32>
    %14 = vector.broadcast %6 : vector<2x8x1xf32> to vector<2x8x32xf32>
    %15 = arith.subf %0, %14 : vector<2x8x32xf32>
    %cst_9 = arith.constant 9.99999974E-6 : f32
    %16 = vector.broadcast %cst_9 : f32 to vector<2x8x1xf32>
    %17 = arith.addf %13, %16 : vector<2x8x1xf32>
    %18 = math.rsqrt %17 : vector<2x8x1xf32>
    %19 = vector.broadcast %18 : vector<2x8x1xf32> to vector<2x8x32xf32>
    %20 = arith.mulf %15, %19 : vector<2x8x32xf32>
    %21 = vector.shape_cast %1 : vector<1x32xf32> to vector<1x1x32xf32>
    %22 = vector.broadcast %21 : vector<1x1x32xf32> to vector<2x8x32xf32>
    %23 = arith.mulf %20, %22 : vector<2x8x32xf32>
    %24 = vector.shape_cast %2 : vector<1x32xf32> to vector<1x1x32xf32>
    %25 = vector.broadcast %24 : vector<1x1x32xf32> to vector<2x8x32xf32>
    %26 = arith.addf %23, %25 : vector<2x8x32xf32>
    %c0_10 = arith.constant 0 : index
    %c0_11 = arith.constant 0 : index
    %c0_12 = arith.constant 0 : index
    %27 = vector.load %arg2[%c0_10, %c0_11, %c0_12] : memref<2x8x32xf32, #tpu.memory_space<vmem>>, vector<2x8x32xf32>
    %28 = arith.addf %26, %27 : vector<2x8x32xf32>
    %29 = vector.shape_cast %28 : vector<2x8x32xf32> to vector<16x32xf32>
    %30 = arith.truncf %29 : vector<16x32xf32> to vector<16x32xbf16>
    %31 = vector.shape_cast %26 : vector<2x8x32xf32> to vector<16x32xf32>
    %32 = arith.truncf %31 : vector<16x32xf32> to vector<16x32xbf16>
    %c0_13 = arith.constant 0 : index
    %c0_14 = arith.constant 0 : index
    %33 = vector.load %arg6[%c0_13, %c0_14] : memref<32x64xbf16, #tpu.memory_space<vmem>>, vector<32x64xbf16>
    %cst_15 = arith.constant dense<0.000000e+00> : vector<16x64xf32>
    %34 = tpu.matmul %30, %33, %cst_15 {dimension_numbers = #tpu.dot_dimension_numbers<[1], [0], [0], [1], [0, 0, 1, 1], [], []>} : vector<16x32xbf16>, vector<32x64xbf16>, vector<16x64xf32> -> vector<16x64xf32>
    %c0_16 = arith.constant 0 : index
    %c0_17 = arith.constant 0 : index
    %35 = vector.load %arg7[%c0_16, %c0_17] : memref<1x64xf32, #tpu.memory_space<vmem>>, vector<1x64xf32>
    %36 = vector.broadcast %35 : vector<1x64xf32> to vector<16x64xf32>
    %37 = arith.addf %34, %36 : vector<16x64xf32>
    %c0_18 = arith.constant 0 : index
    %c0_19 = arith.constant 0 : index
    %38 = vector.load %arg8[%c0_18, %c0_19] : memref<32x32xbf16, #tpu.memory_space<vmem>>, vector<32x32xbf16>
    %cst_20 = arith.constant dense<0.000000e+00> : vector<16x32xf32>
    %39 = tpu.matmul %32, %38, %cst_20 {dimension_numbers = #tpu.dot_dimension_numbers<[1], [0], [0], [1], [0, 0, 1, 1], [], []>} : vector<16x32xbf16>, vector<32x32xbf16>, vector<16x32xf32> -> vector<16x32xf32>
    %c0_21 = arith.constant 0 : index
    %c0_22 = arith.constant 0 : index
    %40 = vector.load %arg9[%c0_21, %c0_22] : memref<1x32xf32, #tpu.memory_space<vmem>>, vector<1x32xf32>
    %41 = vector.broadcast %40 : vector<1x32xf32> to vector<16x32xf32>
    %42 = arith.addf %39, %41 : vector<16x32xf32>
    %43 = vector.extract_strided_slice %37 {offsets = [0, 0], sizes = [16, 32], strides = [1, 1]} : vector<16x64xf32> to vector<16x32xf32>
    %44 = vector.shape_cast %43 : vector<16x32xf32> to vector<2x8x32xf32>
    %45 = arith.truncf %44 : vector<2x8x32xf32> to vector<2x8x32xbf16>
    %46 = vector.extract_strided_slice %37 {offsets = [0, 32], sizes = [16, 32], strides = [1, 1]} : vector<16x64xf32> to vector<16x32xf32>
    %47 = vector.shape_cast %46 : vector<16x32xf32> to vector<2x8x32xf32>
    %48 = arith.truncf %47 : vector<2x8x32xf32> to vector<2x8x32xbf16>
    %49 = vector.shape_cast %42 : vector<16x32xf32> to vector<2x8x32xf32>
    %50 = arith.truncf %49 : vector<2x8x32xf32> to vector<2x8x32xbf16>
    %c0_23 = arith.constant 0 : index
    %c0_24 = arith.constant 0 : index
    %c0_25 = arith.constant 0 : index
    %51 = vector.load %arg3[%c0_23, %c0_24, %c0_25] : memref<2x1x8xf32, #tpu.memory_space<vmem>>, vector<2x1x8xf32>
    %52 = vector.extract_strided_slice %45 {offsets = [0, 0, 0], sizes = [2, 8, 8], strides = [1, 1, 1]} : vector<2x8x32xbf16> to vector<2x8x8xbf16>
    %53 = vector.extract_strided_slice %48 {offsets = [0, 0, 0], sizes = [2, 8, 8], strides = [1, 1, 1]} : vector<2x8x32xbf16> to vector<2x8x8xbf16>
    "tpu.trace_start"() <{level = 10 : i32, message = "bqd,bkd->bqk"}> : () -> ()
    %cst_26 = arith.constant dense<0.000000e+00> : vector<2x8x8xf32>
    %54 = tpu.matmul %52, %53, %cst_26 {dimension_numbers = #tpu.dot_dimension_numbers<[2], [2], [1], [1], [0, 0, 0, 1, 1, 1], [0], [0]>} : vector<2x8x8xbf16>, vector<2x8x8xbf16>, vector<2x8x8xf32> -> vector<2x8x8xf32>
    "tpu.trace_stop"() : () -> ()
    %55 = vector.broadcast %51 : vector<2x1x8xf32> to vector<2x8x8xf32>
    %56 = arith.addf %54, %55 : vector<2x8x8xf32>
    %cst_27 = arith.constant dense<0xFF800000> : vector<2x8xf32>
    %57 = vector.multi_reduction <maximumf>, %56, %cst_27 [2] : vector<2x8x8xf32> to vector<2x8xf32>
    %58 = vector.shape_cast %57 : vector<2x8xf32> to vector<2x8x1xf32>
    %59 = vector.broadcast %58 : vector<2x8x1xf32> to vector<2x8x8xf32>
    %60 = arith.subf %56, %59 : vector<2x8x8xf32>
    %61 = math.exp %60 : vector<2x8x8xf32>
    %cst_28 = arith.constant dense<0.000000e+00> : vector<2x8xf32>
    %62 = vector.multi_reduction <add>, %61, %cst_28 [2] : vector<2x8x8xf32> to vector<2x8xf32>
    %63 = vector.shape_cast %62 : vector<2x8xf32> to vector<2x8x1xf32>
    %64 = tpu.reciprocal %63 {approx = true} : vector<2x8x1xf32> -> vector<2x8x1xf32>
    %65 = vector.broadcast %64 : vector<2x8x1xf32> to vector<2x8x8xf32>
    %66 = arith.mulf %61, %65 : vector<2x8x8xf32>
    %67 = arith.truncf %66 : vector<2x8x8xf32> to vector<2x8x8xbf16>
    %68 = vector.extract_strided_slice %50 {offsets = [0, 0, 0], sizes = [2, 8, 8], strides = [1, 1, 1]} : vector<2x8x32xbf16> to vector<2x8x8xbf16>
    "tpu.trace_start"() <{level = 10 : i32, message = "bqk,bkd->bqd"}> : () -> ()
    %cst_29 = arith.constant dense<0.000000e+00> : vector<2x8x8xf32>
    %69 = tpu.matmul %67, %68, %cst_29 {dimension_numbers = #tpu.dot_dimension_numbers<[2], [1], [1], [2], [0, 0, 0, 1, 1, 2], [0], [0]>} : vector<2x8x8xbf16>, vector<2x8x8xbf16>, vector<2x8x8xf32> -> vector<2x8x8xf32>
    "tpu.trace_stop"() : () -> ()
    %70 = vector.extract_strided_slice %45 {offsets = [0, 0, 8], sizes = [2, 8, 8], strides = [1, 1, 1]} : vector<2x8x32xbf16> to vector<2x8x8xbf16>
    %71 = vector.extract_strided_slice %48 {offsets = [0, 0, 8], sizes = [2, 8, 8], strides = [1, 1, 1]} : vector<2x8x32xbf16> to vector<2x8x8xbf16>
    "tpu.trace_start"() <{level = 10 : i32, message = "bqd,bkd->bqk"}> : () -> ()
    %cst_30 = arith.constant dense<0.000000e+00> : vector<2x8x8xf32>
    %72 = tpu.matmul %70, %71, %cst_30 {dimension_numbers = #tpu.dot_dimension_numbers<[2], [2], [1], [1], [0, 0, 0, 1, 1, 1], [0], [0]>} : vector<2x8x8xbf16>, vector<2x8x8xbf16>, vector<2x8x8xf32> -> vector<2x8x8xf32>
    "tpu.trace_stop"() : () -> ()
    %73 = vector.broadcast %51 : vector<2x1x8xf32> to vector<2x8x8xf32>
    %74 = arith.addf %72, %73 : vector<2x8x8xf32>
    %cst_31 = arith.constant dense<0xFF800000> : vector<2x8xf32>
    %75 = vector.multi_reduction <maximumf>, %74, %cst_31 [2] : vector<2x8x8xf32> to vector<2x8xf32>
    %76 = vector.shape_cast %75 : vector<2x8xf32> to vector<2x8x1xf32>
    %77 = vector.broadcast %76 : vector<2x8x1xf32> to vector<2x8x8xf32>
    %78 = arith.subf %74, %77 : vector<2x8x8xf32>
    %79 = math.exp %78 : vector<2x8x8xf32>
    %cst_32 = arith.constant dense<0.000000e+00> : vector<2x8xf32>
    %80 = vector.multi_reduction <add>, %79, %cst_32 [2] : vector<2x8x8xf32> to vector<2x8xf32>
    %81 = vector.shape_cast %80 : vector<2x8xf32> to vector<2x8x1xf32>
    %82 = tpu.reciprocal %81 {approx = true} : vector<2x8x1xf32> -> vector<2x8x1xf32>
    %83 = vector.broadcast %82 : vector<2x8x1xf32> to vector<2x8x8xf32>
    %84 = arith.mulf %79, %83 : vector<2x8x8xf32>
    %85 = arith.truncf %84 : vector<2x8x8xf32> to vector<2x8x8xbf16>
    %86 = vector.extract_strided_slice %50 {offsets = [0, 0, 8], sizes = [2, 8, 8], strides = [1, 1, 1]} : vector<2x8x32xbf16> to vector<2x8x8xbf16>
    "tpu.trace_start"() <{level = 10 : i32, message = "bqk,bkd->bqd"}> : () -> ()
    %cst_33 = arith.constant dense<0.000000e+00> : vector<2x8x8xf32>
    %87 = tpu.matmul %85, %86, %cst_33 {dimension_numbers = #tpu.dot_dimension_numbers<[2], [1], [1], [2], [0, 0, 0, 1, 1, 2], [0], [0]>} : vector<2x8x8xbf16>, vector<2x8x8xbf16>, vector<2x8x8xf32> -> vector<2x8x8xf32>
    "tpu.trace_stop"() : () -> ()
    %88 = vector.extract_strided_slice %45 {offsets = [0, 0, 16], sizes = [2, 8, 8], strides = [1, 1, 1]} : vector<2x8x32xbf16> to vector<2x8x8xbf16>
    %89 = vector.extract_strided_slice %48 {offsets = [0, 0, 16], sizes = [2, 8, 8], strides = [1, 1, 1]} : vector<2x8x32xbf16> to vector<2x8x8xbf16>
    "tpu.trace_start"() <{level = 10 : i32, message = "bqd,bkd->bqk"}> : () -> ()
    %cst_34 = arith.constant dense<0.000000e+00> : vector<2x8x8xf32>
    %90 = tpu.matmul %88, %89, %cst_34 {dimension_numbers = #tpu.dot_dimension_numbers<[2], [2], [1], [1], [0, 0, 0, 1, 1, 1], [0], [0]>} : vector<2x8x8xbf16>, vector<2x8x8xbf16>, vector<2x8x8xf32> -> vector<2x8x8xf32>
    "tpu.trace_stop"() : () -> ()
    %91 = vector.broadcast %51 : vector<2x1x8xf32> to vector<2x8x8xf32>
    %92 = arith.addf %90, %91 : vector<2x8x8xf32>
    %cst_35 = arith.constant dense<0xFF800000> : vector<2x8xf32>
    %93 = vector.multi_reduction <maximumf>, %92, %cst_35 [2] : vector<2x8x8xf32> to vector<2x8xf32>
    %94 = vector.shape_cast %93 : vector<2x8xf32> to vector<2x8x1xf32>
    %95 = vector.broadcast %94 : vector<2x8x1xf32> to vector<2x8x8xf32>
    %96 = arith.subf %92, %95 : vector<2x8x8xf32>
    %97 = math.exp %96 : vector<2x8x8xf32>
    %cst_36 = arith.constant dense<0.000000e+00> : vector<2x8xf32>
    %98 = vector.multi_reduction <add>, %97, %cst_36 [2] : vector<2x8x8xf32> to vector<2x8xf32>
    %99 = vector.shape_cast %98 : vector<2x8xf32> to vector<2x8x1xf32>
    %100 = tpu.reciprocal %99 {approx = true} : vector<2x8x1xf32> -> vector<2x8x1xf32>
    %101 = vector.broadcast %100 : vector<2x8x1xf32> to vector<2x8x8xf32>
    %102 = arith.mulf %97, %101 : vector<2x8x8xf32>
    %103 = arith.truncf %102 : vector<2x8x8xf32> to vector<2x8x8xbf16>
    %104 = vector.extract_strided_slice %50 {offsets = [0, 0, 16], sizes = [2, 8, 8], strides = [1, 1, 1]} : vector<2x8x32xbf16> to vector<2x8x8xbf16>
    "tpu.trace_start"() <{level = 10 : i32, message = "bqk,bkd->bqd"}> : () -> ()
    %cst_37 = arith.constant dense<0.000000e+00> : vector<2x8x8xf32>
    %105 = tpu.matmul %103, %104, %cst_37 {dimension_numbers = #tpu.dot_dimension_numbers<[2], [1], [1], [2], [0, 0, 0, 1, 1, 2], [0], [0]>} : vector<2x8x8xbf16>, vector<2x8x8xbf16>, vector<2x8x8xf32> -> vector<2x8x8xf32>
    "tpu.trace_stop"() : () -> ()
    %106 = vector.extract_strided_slice %45 {offsets = [0, 0, 24], sizes = [2, 8, 8], strides = [1, 1, 1]} : vector<2x8x32xbf16> to vector<2x8x8xbf16>
    %107 = vector.extract_strided_slice %48 {offsets = [0, 0, 24], sizes = [2, 8, 8], strides = [1, 1, 1]} : vector<2x8x32xbf16> to vector<2x8x8xbf16>
    "tpu.trace_start"() <{level = 10 : i32, message = "bqd,bkd->bqk"}> : () -> ()
    %cst_38 = arith.constant dense<0.000000e+00> : vector<2x8x8xf32>
    %108 = tpu.matmul %106, %107, %cst_38 {dimension_numbers = #tpu.dot_dimension_numbers<[2], [2], [1], [1], [0, 0, 0, 1, 1, 1], [0], [0]>} : vector<2x8x8xbf16>, vector<2x8x8xbf16>, vector<2x8x8xf32> -> vector<2x8x8xf32>
    "tpu.trace_stop"() : () -> ()
    %109 = vector.broadcast %51 : vector<2x1x8xf32> to vector<2x8x8xf32>
    %110 = arith.addf %108, %109 : vector<2x8x8xf32>
    %cst_39 = arith.constant dense<0xFF800000> : vector<2x8xf32>
    %111 = vector.multi_reduction <maximumf>, %110, %cst_39 [2] : vector<2x8x8xf32> to vector<2x8xf32>
    %112 = vector.shape_cast %111 : vector<2x8xf32> to vector<2x8x1xf32>
    %113 = vector.broadcast %112 : vector<2x8x1xf32> to vector<2x8x8xf32>
    %114 = arith.subf %110, %113 : vector<2x8x8xf32>
    %115 = math.exp %114 : vector<2x8x8xf32>
    %cst_40 = arith.constant dense<0.000000e+00> : vector<2x8xf32>
    %116 = vector.multi_reduction <add>, %115, %cst_40 [2] : vector<2x8x8xf32> to vector<2x8xf32>
    %117 = vector.shape_cast %116 : vector<2x8xf32> to vector<2x8x1xf32>
    %118 = tpu.reciprocal %117 {approx = true} : vector<2x8x1xf32> -> vector<2x8x1xf32>
    %119 = vector.broadcast %118 : vector<2x8x1xf32> to vector<2x8x8xf32>
    %120 = arith.mulf %115, %119 : vector<2x8x8xf32>
    %121 = arith.truncf %120 : vector<2x8x8xf32> to vector<2x8x8xbf16>
    %122 = vector.extract_strided_slice %50 {offsets = [0, 0, 24], sizes = [2, 8, 8], strides = [1, 1, 1]} : vector<2x8x32xbf16> to vector<2x8x8xbf16>
    "tpu.trace_start"() <{level = 10 : i32, message = "bqk,bkd->bqd"}> : () -> ()
    %cst_41 = arith.constant dense<0.000000e+00> : vector<2x8x8xf32>
    %123 = tpu.matmul %121, %122, %cst_41 {dimension_numbers = #tpu.dot_dimension_numbers<[2], [1], [1], [2], [0, 0, 0, 1, 1, 2], [0], [0]>} : vector<2x8x8xbf16>, vector<2x8x8xbf16>, vector<2x8x8xf32> -> vector<2x8x8xf32>
    "tpu.trace_stop"() : () -> ()
    %124 = tpu.concatenate %69, %87, %105, %123 in 2 : vector<2x8x8xf32>, vector<2x8x8xf32>, vector<2x8x8xf32>, vector<2x8x8xf32> -> vector<2x8x32xf32>
    %125 = vector.shape_cast %124 : vector<2x8x32xf32> to vector<16x32xf32>
    %126 = arith.truncf %125 : vector<16x32xf32> to vector<16x32xbf16>
    %c0_42 = arith.constant 0 : index
    %c0_43 = arith.constant 0 : index
    %127 = vector.load %arg10[%c0_42, %c0_43] : memref<32x32xbf16, #tpu.memory_space<vmem>>, vector<32x32xbf16>
    %cst_44 = arith.constant dense<0.000000e+00> : vector<16x32xf32>
    %128 = tpu.matmul %126, %127, %cst_44 {dimension_numbers = #tpu.dot_dimension_numbers<[1], [0], [0], [1], [0, 0, 1, 1], [], []>} : vector<16x32xbf16>, vector<32x32xbf16>, vector<16x32xf32> -> vector<16x32xf32>
    %c0_45 = arith.constant 0 : index
    %c0_46 = arith.constant 0 : index
    %129 = vector.load %arg11[%c0_45, %c0_46] : memref<1x32xf32, #tpu.memory_space<vmem>>, vector<1x32xf32>
    %130 = vector.broadcast %129 : vector<1x32xf32> to vector<16x32xf32>
    %131 = arith.addf %128, %130 : vector<16x32xf32>
    %132 = vector.shape_cast %131 : vector<16x32xf32> to vector<2x8x32xf32>
    %133 = arith.addf %0, %132 : vector<2x8x32xf32>
    %c0_47 = arith.constant 0 : index
    %c0_48 = arith.constant 0 : index
    %134 = vector.load %arg12[%c0_47, %c0_48] : memref<1x32xf32, #tpu.memory_space<vmem>>, vector<1x32xf32>
    %c0_49 = arith.constant 0 : index
    %c0_50 = arith.constant 0 : index
    %135 = vector.load %arg13[%c0_49, %c0_50] : memref<1x32xf32, #tpu.memory_space<vmem>>, vector<1x32xf32>
    %cst_51 = arith.constant dense<0.000000e+00> : vector<2x8xf32>
    %136 = vector.multi_reduction <add>, %133, %cst_51 [2] : vector<2x8x32xf32> to vector<2x8xf32>
    %137 = vector.shape_cast %136 : vector<2x8xf32> to vector<2x8x1xf32>
    %cst_52 = arith.constant 3.200000e+01 : f32
    %138 = vector.broadcast %cst_52 : f32 to vector<2x8x1xf32>
    %139 = arith.divf %137, %138 : vector<2x8x1xf32>
    %140 = vector.broadcast %139 : vector<2x8x1xf32> to vector<2x8x32xf32>
    %141 = arith.subf %133, %140 : vector<2x8x32xf32>
    %142 = arith.mulf %141, %141 : vector<2x8x32xf32>
    %cst_53 = arith.constant dense<0.000000e+00> : vector<2x8xf32>
    %143 = vector.multi_reduction <add>, %142, %cst_53 [2] : vector<2x8x32xf32> to vector<2x8xf32>
    %144 = vector.shape_cast %143 : vector<2x8xf32> to vector<2x8x1xf32>
    %cst_54 = arith.constant 3.200000e+01 : f32
    %145 = vector.broadcast %cst_54 : f32 to vector<2x8x1xf32>
    %146 = arith.divf %144, %145 : vector<2x8x1xf32>
    %147 = vector.broadcast %139 : vector<2x8x1xf32> to vector<2x8x32xf32>
    %148 = arith.subf %133, %147 : vector<2x8x32xf32>
    %cst_55 = arith.constant 9.99999974E-6 : f32
    %149 = vector.broadcast %cst_55 : f32 to vector<2x8x1xf32>
    %150 = arith.addf %146, %149 : vector<2x8x1xf32>
    %151 = math.rsqrt %150 : vector<2x8x1xf32>
    %152 = vector.broadcast %151 : vector<2x8x1xf32> to vector<2x8x32xf32>
    %153 = arith.mulf %148, %152 : vector<2x8x32xf32>
    %154 = vector.shape_cast %134 : vector<1x32xf32> to vector<1x1x32xf32>
    %155 = vector.broadcast %154 : vector<1x1x32xf32> to vector<2x8x32xf32>
    %156 = arith.mulf %153, %155 : vector<2x8x32xf32>
    %157 = vector.shape_cast %135 : vector<1x32xf32> to vector<1x1x32xf32>
    %158 = vector.broadcast %157 : vector<1x1x32xf32> to vector<2x8x32xf32>
    %159 = arith.addf %156, %158 : vector<2x8x32xf32>
    %160 = vector.shape_cast %159 : vector<2x8x32xf32> to vector<16x32xf32>
    %161 = arith.truncf %160 : vector<16x32xf32> to vector<16x32xbf16>
    %c0_56 = arith.constant 0 : index
    %c0_57 = arith.constant 0 : index
    %162 = vector.load %arg14[%c0_56, %c0_57] : memref<32x128xbf16, #tpu.memory_space<vmem>>, vector<32x128xbf16>
    %cst_58 = arith.constant dense<0.000000e+00> : vector<16x128xf32>
    %163 = tpu.matmul %161, %162, %cst_58 {dimension_numbers = #tpu.dot_dimension_numbers<[1], [0], [0], [1], [0, 0, 1, 1], [], []>} : vector<16x32xbf16>, vector<32x128xbf16>, vector<16x128xf32> -> vector<16x128xf32>
    %c0_59 = arith.constant 0 : index
    %c0_60 = arith.constant 0 : index
    %164 = vector.load %arg15[%c0_59, %c0_60] : memref<1x128xf32, #tpu.memory_space<vmem>>, vector<1x128xf32>
    %165 = vector.broadcast %164 : vector<1x128xf32> to vector<16x128xf32>
    %166 = arith.addf %163, %165 : vector<16x128xf32>
    %cst_61 = arith.constant 1.702000e+00 : f32
    %167 = vector.broadcast %cst_61 : f32 to vector<16x128xf32>
    %168 = arith.mulf %167, %166 : vector<16x128xf32>
    %169 = arith.negf %168 : vector<16x128xf32>
    %170 = math.exp %169 : vector<16x128xf32>
    %cst_62 = arith.constant 1.000000e+00 : f32
    %171 = vector.broadcast %cst_62 : f32 to vector<16x128xf32>
    %172 = arith.addf %171, %170 : vector<16x128xf32>
    %173 = arith.divf %171, %172 : vector<16x128xf32>
    %174 = arith.mulf %166, %173 : vector<16x128xf32>
    %175 = arith.truncf %174 : vector<16x128xf32> to vector<16x128xbf16>
    %c0_63 = arith.constant 0 : index
    %c0_64 = arith.constant 0 : index
    %176 = vector.load %arg16[%c0_63, %c0_64] : memref<128x32xbf16, #tpu.memory_space<vmem>>, vector<128x32xbf16>
    %cst_65 = arith.constant dense<0.000000e+00> : vector<16x32xf32>
    %177 = tpu.matmul %175, %176, %cst_65 {dimension_numbers = #tpu.dot_dimension_numbers<[1], [0], [0], [1], [0, 0, 1, 1], [], []>} : vector<16x128xbf16>, vector<128x32xbf16>, vector<16x32xf32> -> vector<16x32xf32>
    %c0_66 = arith.constant 0 : index
    %c0_67 = arith.constant 0 : index
    %178 = vector.load %arg17[%c0_66, %c0_67] : memref<1x32xf32, #tpu.memory_space<vmem>>, vector<1x32xf32>
    %179 = vector.broadcast %178 : vector<1x32xf32> to vector<16x32xf32>
    %180 = arith.addf %177, %179 : vector<16x32xf32>
    %181 = vector.shape_cast %180 : vector<16x32xf32> to vector<2x8x32xf32>
    %182 = arith.addf %133, %181 : vector<2x8x32xf32>
    %c0_68 = arith.constant 0 : index
    %c0_69 = arith.constant 0 : index
    %c0_70 = arith.constant 0 : index
    %183 = vector.load %arg18[%c0_68, %c0_69, %c0_70] : memref<2x8x32xf32, #tpu.memory_space<vmem>>, vector<2x8x32xf32>
    tpu.vector_store %arg18[%c0_68, %c0_69, %c0_70], %182 {strides = array<i32>} : memref<2x8x32xf32, #tpu.memory_space<vmem>>, vector<2x8x32xf32>,
    %c0_71 = arith.constant 0 : index
    %c0_72 = arith.constant 0 : index
    %c0_73 = arith.constant 0 : index
    %184 = vector.load %arg19[%c0_71, %c0_72, %c0_73] : memref<2x8x32xf32, #tpu.memory_space<vmem>>, vector<2x8x32xf32>
    tpu.vector_store %arg19[%c0_71, %c0_72, %c0_73], %26 {strides = array<i32>} : memref<2x8x32xf32, #tpu.memory_space<vmem>>, vector<2x8x32xf32>,
    return
  }
  func.func @transform_0(%arg0: i32) -> (i32, i32, i32) {
    %c0_i32 = arith.constant 0 : i32
    %c0_i32_0 = arith.constant 0 : i32
    %c0_i32_1 = arith.constant 0 : i32
    return %arg0, %c0_i32, %c0_i32_0 : i32, i32, i32
  }
  func.func @transform_1(%arg0: i32) -> (i32, i32, i32) {
    %c0_i32 = arith.constant 0 : i32
    %c0_i32_0 = arith.constant 0 : i32
    %c0_i32_1 = arith.constant 0 : i32
    return %arg0, %c0_i32, %c0_i32_0 : i32, i32, i32
  }
  func.func @transform_2(%arg0: i32) -> (i32, i32, i32) {
    %c0_i32 = arith.constant 0 : i32
    %c0_i32_0 = arith.constant 0 : i32
    %c0_i32_1 = arith.constant 0 : i32
    return %arg0, %c0_i32, %c0_i32_0 : i32, i32, i32
  }
  func.func @transform_3(%arg0: i32) -> (i32, i32) {
    %c0_i32 = arith.constant 0 : i32
    %c0_i32_0 = arith.constant 0 : i32
    %c0_i32_1 = arith.constant 0 : i32
    return %c0_i32, %c0_i32_0 : i32, i32
  }
  func.func @transform_4(%arg0: i32) -> (i32, i32) {
    %c0_i32 = arith.constant 0 : i32
    %c0_i32_0 = arith.constant 0 : i32
    %c0_i32_1 = arith.constant 0 : i32
    return %c0_i32, %c0_i32_0 : i32, i32
  }
  func.func @transform_5(%arg0: i32) -> (i32, i32) {
    %c0_i32 = arith.constant 0 : i32
    %c0_i32_0 = arith.constant 0 : i32
    %c0_i32_1 = arith.constant 0 : i32
    return %c0_i32, %c0_i32_0 : i32, i32
  }
  func.func @transform_6(%arg0: i32) -> (i32, i32) {
    %c0_i32 = arith.constant 0 : i32
    %c0_i32_0 = arith.constant 0 : i32
    %c0_i32_1 = arith.constant 0 : i32
    return %c0_i32, %c0_i32_0 : i32, i32
  }
  func.func @transform_7(%arg0: i32) -> (i32, i32) {
    %c0_i32 = arith.constant 0 : i32
    %c0_i32_0 = arith.constant 0 : i32
    %c0_i32_1 = arith.constant 0 : i32
    return %c0_i32, %c0_i32_0 : i32, i32
  }
  func.func @transform_8(%arg0: i32) -> (i32, i32) {
    %c0_i32 = arith.constant 0 : i32
    %c0_i32_0 = arith.constant 0 : i32
    %c0_i32_1 = arith.constant 0 : i32
    return %c0_i32, %c0_i32_0 : i32, i32
  }
  func.func @transform_9(%arg0: i32) -> (i32, i32) {
    %c0_i32 = arith.constant 0 : i32
    %c0_i32_0 = arith.constant 0 : i32
    %c0_i32_1 = arith.constant 0 : i32
    return %c0_i32, %c0_i32_0 : i32, i32
  }
  func.func @transform_10(%arg0: i32) -> (i32, i32) {
    %c0_i32 = arith.constant 0 : i32
    %c0_i32_0 = arith.constant 0 : i32
    %c0_i32_1 = arith.constant 0 : i32
    return %c0_i32, %c0_i32_0 : i32, i32
  }
  func.func @transform_11(%arg0: i32) -> (i32, i32) {
    %c0_i32 = arith.constant 0 : i32
    %c0_i32_0 = arith.constant 0 : i32
    %c0_i32_1 = arith.constant 0 : i32
    return %c0_i32, %c0_i32_0 : i32, i32
  }
  func.func @transform_12(%arg0: i32) -> (i32, i32) {
    %c0_i32 = arith.constant 0 : i32
    %c0_i32_0 = arith.constant 0 : i32
    %c0_i32_1 = arith.constant 0 : i32
    return %c0_i32, %c0_i32_0 : i32, i32
  }
  func.func @transform_13(%arg0: i32) -> (i32, i32) {
    %c0_i32 = arith.constant 0 : i32
    %c0_i32_0 = arith.constant 0 : i32
    %c0_i32_1 = arith.constant 0 : i32
    return %c0_i32, %c0_i32_0 : i32, i32
  }
  func.func @transform_14(%arg0: i32) -> (i32, i32) {
    %c0_i32 = arith.constant 0 : i32
    %c0_i32_0 = arith.constant 0 : i32
    %c0_i32_1 = arith.constant 0 : i32
    return %c0_i32, %c0_i32_0 : i32, i32
  }
  func.func @transform_15(%arg0: i32) -> (i32, i32) {
    %c0_i32 = arith.constant 0 : i32
    %c0_i32_0 = arith.constant 0 : i32
    %c0_i32_1 = arith.constant 0 : i32
    return %c0_i32, %c0_i32_0 : i32, i32
  }
  func.func @transform_16(%arg0: i32) -> (i32, i32) {
    %c0_i32 = arith.constant 0 : i32
    %c0_i32_0 = arith.constant 0 : i32
    %c0_i32_1 = arith.constant 0 : i32
    return %c0_i32, %c0_i32_0 : i32, i32
  }
  func.func @transform_17(%arg0: i32) -> (i32, i32, i32) {
    %c0_i32 = arith.constant 0 : i32
    %c0_i32_0 = arith.constant 0 : i32
    %c0_i32_1 = arith.constant 0 : i32
    return %arg0, %c0_i32, %c0_i32_0 : i32, i32, i32
  }
  func.func @transform_18(%arg0: i32) -> (i32, i32, i32) {
    %c0_i32 = arith.constant 0 : i32
    %c0_i32_0 = arith.constant 0 : i32
    %c0_i32_1 = arith.constant 0 : i32
    return %arg0, %c0_i32, %c0_i32_0 : i32, i32, i32
  }
}

</mosaic_0001>

<bundles_post_ra>
// kernel: tpu_custom_call.1
= control target key start
LH: loop header
LB: loop body
LE: loop exit
PB: predicated region body
PF: predicated region fallthrough
CT: control target
= control target key end

     0   :  { %s1691_s0 = inlined_call_operand.vmem [shape: f32[2,8,32], index: 0, kind: input, shape index: {}]   ;;  %s1692_s1 = inlined_call_operand.vmem [shape: f32[2,8,32], index: 1, kind: input, shape index: {}]   ;;  %s1693_s2 = inlined_call_operand.hbm [shape: f32[2,1,8], index: 2, kind: input, shape index: {}]   ;;  %s1694_s3 = inlined_call_operand.vmem [shape: f32[1,32], index: 3, kind: input, shape index: {}]   ;;  %s1695_s4 = inlined_call_operand.vmem [shape: f32[1,32], index: 4, kind: input, shape index: {}]   ;;  %s1696_s5 = inlined_call_operand.vmem [shape: bf16[32,64], index: 5, kind: input, shape index: {}]   ;;  %s1697_s6 = inlined_call_operand.vmem [shape: f32[1,64], index: 6, kind: input, shape index: {}]   ;;  %s1698_s7 = inlined_call_operand.vmem [shape: bf16[32,32], index: 7, kind: input, shape index: {}]   ;;  %s1699_s8 = inlined_call_operand.vmem [shape: f32[1,32], index: 8, kind: input, shape index: {}]   ;;  %s1700_s9 = inlined_call_operand.vmem [shape: bf16[32,32], index: 9, kind: input, shape index: {}]   ;;  %s1701_s10 = inlined_call_operand.vmem [shape: f32[1,32], index: 10, kind: input, shape index: {}]   ;;  %s1702_s11 = inlined_call_operand.vmem [shape: f32[1,32], index: 11, kind: input, shape index: {}]   ;;  %s1703_s12 = inlined_call_operand.vmem [shape: f32[1,32], index: 12, kind: input, shape index: {}]   ;;  %s1704_s13 = inlined_call_operand.hbm [shape: bf16[32,128], index: 13, kind: input, shape index: {}]   ;;  %s1705_s14 = inlined_call_operand.vmem [shape: f32[1,128], index: 14, kind: input, shape index: {}]   ;;  %s1706_s15 = inlined_call_operand.vmem [shape: bf16[128,32], index: 15, kind: input, shape index: {}]   ;;  %s1707_s16 = inlined_call_operand.vmem [shape: f32[1,32], index: 16, kind: input, shape index: {}]   ;;  %s1708_s17 = inlined_call_operand.hbm [shape: f32[2,8,32], index: 17, kind: output, shape index: {0}]   ;;  %s1709_s18 = inlined_call_operand.hbm [shape: f32[2,8,32], index: 18, kind: output, shape index: {1}]  }
   0x1   :  { %1712 = sst [smem:[#allocation14_spill]] %s1691_s0 }
   0x2   :  { %1713 = sst [smem:[#allocation15_spill]] %s1692_s1 }
   0x3   :  { %1714 = sst [smem:[#allocation16_spill]] %s1693_s2 }
   0x4   :  { %24 = vsyncpa [#allocation3], 0 }
   0x5   :  { %25 = vsyncpa [#allocation6], 0 }
   0x6   :  { %26 = vsyncpa [#allocation4], 0 }
   0x7   :  { %27 = vsyncpa [#allocation9], 0  ;;  %s1715_s29 = sld [smem:[#allocation16_spill]]  ;;  %s1341_s0 = smov [#allocation2]  }
   0x8   :  { %s38_s19 = sshll.u32 %s1341_s0, 4  ;;  %s69_s21 = sshll.u32 %s1704_s13, 4  ;;  %s39_s19 = int_to_ptr.vmem [resolvable:$true] %s38_s19  ;;  %s70_s21 = int_to_ptr.hbm [resolvable:$true] %s69_s21 }
   0x9   :  { %s1342_s22 = smov 16   ;;  %s1343_s2 = smov 1  }
   0xa   :  { %s1344_s23 = smov [#allocation5]   ;;  %s1345_s25 = smov 64  }
   0xb   :  { %s71_s24 = sshll.u32 %s1344_s23, 4  ;;  %s1346_s26 = smov 4   ;;  %s72_s24 = int_to_ptr.vmem [resolvable:$true] %s71_s24 }
   0xc   :  { %77 = dma.hbm_to_vmem [thread:$0]  %s70_s21, 256, %s72_s24, [#allocation6], %s1345_s25, %s1345_s25, %s1346_s26  }
   0xd   :  { %s36_s30 = sshll.u32 %s1715_s29, 4  ;;  %s37_s30 = int_to_ptr.hbm [resolvable:$true] %s36_s30 }
   0xe   :  { %44 = dma.hbm_to_vmem [thread:$0]  %s37_s30, 32, %s39_s19, [#allocation3], %s1342_s22, %s1342_s22, %s1343_s2  }
   0xf   :  { %1333 = dma.done.wait [#allocation3], 32  }
  0x10   :  { %1334 = vsyncadd [#allocation3], 4294967264 }
  0x11   :  { %1335 = dma.done.wait [#allocation6], 256  }
  0x12   :  { %1336 = vsyncadd [#allocation6], 4294967040  ;;  %vm97_vm0 = vcmask 261120   ;;  %s1716_s13 = sld [smem:[#allocation14_spill]]  ;;  %v1347_v4 = vmov 32.0   ;;  %v1127_v22 = vld [vmem:[%s1696_s5 + $0x8] sm:$0xff] }
  0x13   :  { %1187 = vrcp.f32 %v1347_v4  ;;  %194 = vmatpush.bf16.msra.mxu1 %v1127_v22  ;;  %v1126_v24 = vld [vmem:[%s1696_s5] sm:$0xff]  ;;  %v1129_v28 = vld [vmem:[%s1698_s7 + $0x8] sm:$0xff]  ;;  %s1717_s28 = sld [smem:[#allocation15_spill]]  ;;  %s1348_s0 = smov 88   ;;  %vm327_vm8 = vcmask 1043456   ;;  %vm256_vm9 = vcmask 64512  }
  0x14   :  { %v1128_v31 = vld [vmem:[%s1698_s7] sm:$0xff]  ;;  %s1349_s19 = smov 96   ;;  %s1351_s21 = smov 112   ;;  %vm731_vm10 = vcmask 130048   ;;  %vm734_vm11 = vcmask 195584  }
  0x15   :  { %v1176_v39 = vld [vmem:[%s1694_s3] ss:$0 sm:$0xff]  ;;  %s1353_s2 = smov 120   ;;  %s1354_s23 = smov 104  }
  0x16   :  { %v1177_v43 = vld [vmem:[%s1695_s4] ss:$0 sm:$0xff]  ;;  %s1355_s24 = smov 8   ;;  %s1356_s5 = smov 24  }
  0x17   :  { %195 = vmatpush.bf16.msra.mxu1 %v1126_v24  ;;  %v1178_v59 = vld [vmem:[%s1697_s6] ss:$0 sm:$0xff]  ;;  %s1350_s6 = smov 80  }
  0x18   :  { %v1466_v0 = vld [vmem:[%s1716_s13] sm:$0xff]  ;;  %v1473_v2 = vld [vmem:[%s1716_s13 + $0x8] sm:$0xff]  ;;  %s1359_s13 = smov [#allocation7]  }
  0x19   :  { %v98_v1 = vsel %vm97_vm0, %v1466_v0, 0.0  ;;  %v101_v3 = vsel %vm97_vm0, %v1473_v2, 0.0  ;;  %v1188_v5 = vpop.eup %1187  ;;  %v159_v52 = vld [vmem:[%s1717_s28] sm:$0xff]  ;;  %v160_v53 = vld [vmem:[%s1717_s28 + $0x8] sm:$0xff]  ;;  %s1006_s29 = sshll.u32 %s1359_s13, 4  ;;  %s1007_s29 = int_to_ptr.vmem [resolvable:$true] %s1006_s29 }
  0x1a   :  { %99 = vadd.xlane.f32.xlu0 %v98_v1  ;;  %v105_v6 = vmul.f32 32.0, %v1188_v5  ;;  %vm109_vm1 = vweird.f32 %v1188_v5 }
  0x1b   :  { %231 = vmatpush.bf16.msrb.mxu1 %v1129_v28 }
  0x1c   :  { %v106_v7 = vsub.f32 1.0, %v105_v6 }
  0x1e   :  { %v107_v8 = vmul.f32 %v1188_v5, %v106_v7  ;;  %v1179_v7 = vld [vmem:[%s1699_s8] ss:$0 sm:$0xff]  ;;  %s1352_s8 = smov 72  }
  0x1f   :  { %232 = vmatpush.bf16.msrb.mxu1 %v1128_v31 }
  0x20   :  { %v108_v9 = vadd.f32 %v1188_v5, %v107_v8 }
  0x22   :  { %102 = vadd.xlane.f32.xlu0 %v101_v3  ;;  %v1477_v10 = vsel %vm109_vm1, %v1188_v5, %v108_v9 }
  0x8d   :  { %v100_v11 = vpop.xlane.xlu0 %99 }
  0x8e   :  { %v111_v12 = vmul.f32 %v1477_v10, %v100_v11 }
  0x90   :  { %v113_v13 = vsub.f32 %v1466_v0, %v111_v12 }
  0x92   :  { %v115_v14 = vmul.f32 %v113_v13, %v113_v13 }
  0x94   :  { %v117_v15 = vsel %vm97_vm0, %v115_v14, 0.0 }
  0x95   :  { %118 = vadd.xlane.f32.xlu1 %v117_v15  ;;  %v103_v16 = vpop.xlane.xlu0 %102 }
  0x96   :  { %v112_v17 = vmul.f32 %v1477_v10, %v103_v16 }
  0x98   :  { %v114_v18 = vsub.f32 %v1473_v2, %v112_v17 }
  0x9a   :  { %v116_v19 = vmul.f32 %v114_v18, %v114_v18 }
  0x9c   :  { %v120_v20 = vsel %vm97_vm0, %v116_v19, 0.0 }
  0x9d   :  { %121 = vadd.xlane.f32.xlu1 %v120_v20 }
 0x108   :  { %v119_v21 = vpop.xlane.xlu1 %118 }
 0x109   :  { %v123_v23 = vmul.f32 %v119_v21, %v1477_v10 }
 0x10b   :  { %v125_v25 = vadd.f32 1e-05, %v123_v23 }
 0x10d   :  { %1189 = vrsqrt.f32 %v125_v25  ;;  %vm133_vm3 = vweird.f32 %v125_v25 }
 0x110   :  { %v122_v26 = vpop.xlane.xlu1 %121 }
 0x111   :  { %v124_v27 = vmul.f32 %v122_v26, %v1477_v10 }
 0x113   :  { %v1190_v29 = vpop.eup %1189  ;;  %v126_v30 = vadd.f32 1e-05, %v124_v27 }
 0x114   :  { %v128_v32 = vmul.f32 %v1190_v29, %v125_v25  ;;  %vm134_vm2 = vweird.f32 %v1190_v29 }
 0x115   :  { %1191 = vrsqrt.f32 %v126_v30  ;;  %vm135_vm4 = vmor %vm133_vm3, %vm134_vm2  ;;  %vm143_vm6 = vweird.f32 %v126_v30 }
 0x116   :  { %v129_v33 = vmul.f32 %v1190_v29, %v128_v32 }
 0x118   :  { %v130_v34 = vmul.f32 0.5, %v129_v33 }
 0x11a   :  { %v131_v35 = vsub.f32 1.5, %v130_v34 }
 0x11b   :  { %v1192_v36 = vpop.eup %1191 }
 0x11c   :  { %v132_v37 = vmul.f32 %v1190_v29, %v131_v35  ;;  %v138_v38 = vmul.f32 %v1192_v36, %v126_v30  ;;  %vm144_vm5 = vweird.f32 %v1192_v36 }
 0x11d   :  { %vm145_vm7 = vmor %vm143_vm6, %vm144_vm5 }
 0x11e   :  { %v136_v40 = vsel %vm135_vm4, %v1190_v29, %v132_v37  ;;  %v139_v41 = vmul.f32 %v1192_v36, %v138_v38 }
 0x11f   :  { %v147_v42 = vmul.f32 %v136_v40, %v113_v13  ;;  %v1180_v40 = vld [vmem:[#allocation2] ss:$0 sm:$0xff] }
 0x120   :  { %v140_v44 = vmul.f32 0.5, %v139_v41 }
 0x121   :  { %v152_v45 = vmul.f32 %v1176_v39, %v147_v42 }
 0x122   :  { %v141_v46 = vsub.f32 1.5, %v140_v44  ;;  %v1181_v44 = vld [vmem:[#allocation2 + $0x1] ss:$0 sm:$0xff] }
 0x123   :  { %v157_v47 = vadd.f32 %v1177_v43, %v152_v45 }
 0x124   :  { %v142_v48 = vmul.f32 %v1192_v36, %v141_v46 }
 0x125   :  { %1000 = vst.msk [vmem:[#allocation8] sm:$0xff] %vm97_vm0, %v157_v47  ;;  %v161_v55 = vadd.f32 %v159_v52, %v157_v47 }
 0x126   :  { %v146_v49 = vsel %vm145_vm7, %v1192_v36, %v142_v48 }
 0x127   :  { %v148_v50 = vmul.f32 %v146_v49, %v114_v18 }
 0x129   :  { %v153_v51 = vmul.f32 %v1176_v39, %v148_v50 }
 0x12b   :  { %v158_v54 = vadd.f32 %v1177_v43, %v153_v51 }
 0x12d   :  { %v162_v56 = vadd.f32 %v160_v53, %v158_v54  ;;  %1001 = vst.msk [vmem:[#allocation8 + $0x8] sm:$0xff] %vm97_vm0, %v158_v54  ;;  %v164_v58 = vpack.c.bf16 %v158_v54, %v157_v47 }
 0x12f   :  { %v163_v57 = vpack.c.bf16 %v162_v56, %v161_v55 }
 0x131   :  { %1048 = vmatmul.msk.bf16.vlgmr.msra.gmra.mxu1 %vm97_vm0, %v163_v57 }
 0x141   :  { %1057 = vmatmul.msk.bf16.vlgmr.msrb.gmra.mxu1 %vm97_vm0, %v164_v58 }
 0x1ae   :  { %v197_v60 = vpop.f32.mrf.mxu1 }
 0x1af   :  { %v198_v61 = vadd.f32 %v1178_v59, %v197_v60 }
 0x1b1   :  { %v239_v62 = vpack.c.bf16 %v198_v61, %v198_v61 }
 0x1b3   :  { %v252_v63 = vunpack.c.l.b16 %v239_v62 }
 0x1b5   :  { %v253_v1 = vpack.c.b16 %v252_v63, %v252_v63 }
 0x1b6   :  { %v199_v3 = vpop.f32.mrf.mxu1 }
 0x1b7   :  { %v200_v4 = vadd.f32 %v1178_v59, %v199_v3  ;;  %365 = vrot.lane.b32.xlu0 %v253_v1, %s1348_s0  ;;  %254 = vrot.lane.b32.xlu2 %v253_v1, %s1349_s19 }
 0x1b9   :  { %v240_v5 = vpack.c.bf16 %v200_v4, %v200_v4 }
 0x1bb   :  { %v277_v6 = vunpack.c.l.b16 %v240_v5 }
 0x1bd   :  { %v278_v8 = vpack.c.b16 %v277_v6, %v277_v6 }
 0x1be   :  { %v234_v9 = vpop.f32.mrf.mxu1 }
 0x1bf   :  { %v235_v11 = vadd.f32 %v1179_v7, %v234_v9  ;;  %388 = vrot.lane.b32.xlu1 %v278_v8, %s1348_s0  ;;  %506 = vrot.lane.b32.xlu0 %v278_v8, %s1350_s6 }
 0x1c0   :  { %279 = vrot.lane.b32.xlu2 %v278_v8, %s1349_s19 }
 0x1c1   :  { %v1521_v12 = vpack.c.bf16 %v235_v11, %v235_v11 }
 0x1c3   :  { %v329_v13 = vsel %vm327_vm8, %v1521_v12, 0  ;;  %v434_v3 = vunpack.c.l.b16 %v1521_v12 }
 0x1c4   :  { %338 = vmatpush.bf16.msra.mxu0 %v329_v13 }
 0x1c5   :  { %v1558_v6 = vpack.c.b16 %v434_v3, %v434_v3 }
 0x1c6   :  { %v236_v14 = vpop.f32.mrf.mxu1 }
 0x1c7   :  { %v237_v15 = vadd.f32 %v1179_v7, %v236_v14  ;;  %504 = vrot.lane.b32.xlu1 %v278_v8, %s1351_s21  ;;  %595 = vrot.lane.b32.xlu0 %v253_v1, %s1352_s8 }
 0x1c8   :  { %363 = vrot.lane.b32.xlu2 %v253_v1, %s1353_s2 }
 0x1c9   :  { %v1527_v16 = vpack.c.bf16 %v237_v15, %v237_v15 }
 0x1cb   :  { %v348_v17 = vsel %vm327_vm8, %v1527_v16, 0 }
 0x1cc   :  { %357 = vmatpush.bf16.msra.mxu1 %v348_v17 }
 0x1cf   :  { %593 = vrot.lane.b32.xlu1 %v253_v1, %s1354_s23  ;;  %616 = vrot.lane.b32.xlu0 %v278_v8, %s1354_s23 }
 0x1d0   :  { %386 = vrot.lane.b32.xlu2 %v278_v8, %s1353_s2 }
 0x1d8   :  { %483 = vrot.lane.b32.xlu2 %v253_v1, %s1350_s6 }
 0x1e0   :  { %481 = vrot.lane.b32.xlu2 %v253_v1, %s1351_s21 }
 0x1e8   :  { %618 = vrot.lane.b32.xlu2 %v278_v8, %s1352_s8 }
 0x211   :  { %v255_v18 = vpop.permute.xlu2 %254 }
 0x212   :  { %v261_v19 = vsel %vm256_vm9, %v255_v18, 0 }
 0x213   :  { %270 = vmatpush.bf16.xpose.msra.mxu2 %v261_v19 }
 0x21a   :  { %v280_v20 = vpop.permute.xlu2 %279  ;;  %1058 = vmatmul.msk.bf16.vlgmr.msra.gmra.mxu2 %vm256_vm9, %v239_v62 }
 0x21b   :  { %v285_v21 = vsel %vm256_vm9, %v280_v20, 0 }
 0x21c   :  { %294 = vmatpush.bf16.xpose.msra.mxu3 %v285_v21 }
 0x222   :  { %v364_v22 = vpop.permute.xlu2 %363 }
 0x223   :  { %1059 = vmatmul.msk.bf16.vlgmr.msra.gmra.mxu3 %vm256_vm9, %v240_v5 }
 0x229   :  { %v366_v23 = vpop.permute.xlu0 %365 }
 0x22a   :  { %v387_v24 = vpop.permute.xlu2 %386  ;;  %v371_v25 = vsel %vm256_vm9, %v366_v23, 0 }
 0x22b   :  { %380 = vmatpush.bf16.xpose.msrb.mxu2 %v371_v25 }
 0x231   :  { %v389_v26 = vpop.permute.xlu1 %388  ;;  %v507_v27 = vpop.permute.xlu0 %506 }
 0x232   :  { %v512_v28 = vsel %vm256_vm9, %v507_v27, 0  ;;  %v484_v29 = vpop.permute.xlu2 %483  ;;  %1062 = vmatmul.msk.bf16.vlgmr.msrb.gmra.mxu2 %vm256_vm9, %v364_v22  ;;  %v394_v30 = vsel %vm256_vm9, %v389_v26, 0 }
 0x233   :  { %v489_v31 = vsel %vm256_vm9, %v484_v29, 0  ;;  %403 = vmatpush.bf16.xpose.msrb.mxu3 %v394_v30 }
 0x234   :  { %498 = vmatpush.bf16.xpose.msra.mxu2 %v489_v31 }
 0x239   :  { %v596_v32 = vpop.permute.xlu0 %595  ;;  %v505_v37 = vpop.permute.xlu1 %504 }
 0x23a   :  { %v601_v33 = vsel %vm256_vm9, %v596_v32, 0  ;;  %v482_v34 = vpop.permute.xlu2 %481  ;;  %1063 = vmatmul.msk.bf16.vlgmr.msrb.gmra.mxu3 %vm256_vm9, %v387_v24  ;;  %v458_v32 = vunpack.c.l.b16 %v1527_v16 }
 0x23b   :  { %521 = vmatpush.bf16.xpose.msra.mxu3 %v512_v28 }
 0x23c   :  { %610 = vmatpush.bf16.xpose.msrb.mxu2 %v601_v33 }
 0x241   :  { %v594_v38 = vpop.permute.xlu1 %593  ;;  %v617_v39 = vpop.permute.xlu0 %616 }
 0x242   :  { %v619_v35 = vpop.permute.xlu2 %618  ;;  %1066 = vmatmul.msk.bf16.vlgmr.msra.gmra.mxu2 %vm256_vm9, %v482_v34 }
 0x243   :  { %v624_v36 = vsel %vm256_vm9, %v619_v35, 0  ;;  %v459_v35 = vpack.c.b16 %v458_v32, %v458_v32 }
 0x244   :  { %633 = vmatpush.bf16.xpose.msrb.mxu3 %v624_v36 }
 0x24a   :  { %1067 = vmatmul.msk.bf16.vlgmr.msra.gmra.mxu3 %vm256_vm9, %v505_v37 }
 0x252   :  { %1070 = vmatmul.msk.bf16.vlgmr.msrb.gmra.mxu2 %vm256_vm9, %v594_v38 }
 0x25a   :  { %1071 = vmatmul.msk.bf16.vlgmr.msrb.gmra.mxu3 %vm256_vm9, %v617_v39 }
 0x29d   :  { %v272_v41 = vpop.f32.mrf.mxu2 }
 0x29e   :  { %v273_v42 = vadd.f32 %v1180_v40, %v272_v41 }
 0x2a0   :  { %v300_v43 = vsel %vm256_vm9, %v273_v42, -inf }
 0x2a1   :  { %301 = vmax.xlane.f32.xlu2 %v300_v43 }
 0x2a5   :  { %v274_v45 = vpop.f32.mrf.mxu2 }
 0x2a6   :  { %v296_v46 = vpop.f32.mrf.mxu3 }
 0x2a7   :  { %v297_v47 = vadd.f32 %v1181_v44, %v296_v46 }
 0x2a9   :  { %v303_v48 = vsel %vm256_vm9, %v297_v47, -inf }
 0x2aa   :  { %304 = vmax.xlane.f32.xlu1 %v303_v48 }
 0x2ae   :  { %v298_v49 = vpop.f32.mrf.mxu3 }
 0x2b5   :  { %v382_v50 = vpop.f32.mrf.mxu2 }
 0x2b6   :  { %v383_v51 = vadd.f32 %v1180_v40, %v382_v50 }
 0x2b8   :  { %v409_v52 = vsel %vm256_vm9, %v383_v51, -inf }
 0x2b9   :  { %410 = vmax.xlane.f32.xlu0 %v409_v52 }
 0x2bd   :  { %v384_v53 = vpop.f32.mrf.mxu2  ;;  %v405_v54 = vpop.f32.mrf.mxu3 }
 0x2be   :  { %v406_v55 = vadd.f32 %v1181_v44, %v405_v54 }
 0x2c0   :  { %v412_v56 = vsel %vm256_vm9, %v406_v55, -inf }
 0x2c1   :  { %413 = vmax.xlane.f32.xlu2 %v412_v56 }
 0x2c5   :  { %v407_v57 = vpop.f32.mrf.mxu3  ;;  %v500_v58 = vpop.f32.mrf.mxu2 }
 0x2c6   :  { %v501_v59 = vadd.f32 %v1180_v40, %v500_v58 }
 0x2c8   :  { %v527_v60 = vsel %vm256_vm9, %v501_v59, -inf }
 0x2c9   :  { %528 = vmax.xlane.f32.xlu1 %v527_v60 }
 0x2cd   :  { %v502_v61 = vpop.f32.mrf.mxu2  ;;  %v523_v62 = vpop.f32.mrf.mxu3 }
 0x2ce   :  { %v524_v63 = vadd.f32 %v1181_v44, %v523_v62 }
 0x2d0   :  { %v530_v1 = vsel %vm256_vm9, %v524_v63, -inf }
 0x2d1   :  { %531 = vmax.xlane.f32.xlu0 %v530_v1 }
 0x2d5   :  { %v525_v4 = vpop.f32.mrf.mxu3  ;;  %v612_v5 = vpop.f32.mrf.mxu2 }
 0x2d6   :  { %v613_v14 = vadd.f32 %v1180_v40, %v612_v5 }
 0x2d8   :  { %v639_v15 = vsel %vm256_vm9, %v613_v14, -inf }
 0x2d9   :  { %436 = vrot.lane.b32.xlu2 %v1558_v6, %s1353_s2 }
 0x2dd   :  { %v614_v7 = vpop.f32.mrf.mxu2  ;;  %v635_v8 = vpop.f32.mrf.mxu3 }
 0x2de   :  { %v636_v9 = vadd.f32 %v1181_v44, %v635_v8 }
 0x2e0   :  { %v642_v11 = vsel %vm256_vm9, %v636_v9, -inf }
 0x2e1   :  { %643 = vmax.xlane.f32.xlu1 %v642_v11 }
 0x2e5   :  { %v637_v13 = vpop.f32.mrf.mxu3 }
 0x302   :  { %640 = vmax.xlane.f32.xlu2 %v639_v15 }
 0x314   :  { %v302_v17 = vpop.xlane.xlu2 %301 }
 0x315   :  { %v306_v12 = vsub.f32 %v273_v42, %v302_v17 }
 0x317   :  { %v308_v18 = vmul.f32 1.442695, %v306_v12 }
 0x319   :  { %1193 = vpow2.f32 %v308_v18 }
 0x31d   :  { %v305_v19 = vpop.xlane.xlu1 %304 }
 0x31e   :  { %v307_v20 = vsub.f32 %v297_v47, %v305_v19 }
 0x31f   :  { %v1564_v21 = vpop.eup %1193 }
 0x320   :  { %v310_v22 = vmul.f32 1.442695, %v307_v20  ;;  %v312_v23 = vsel %vm256_vm9, %v1564_v21, 0.0 }
 0x321   :  { %313 = vadd.xlane.f32.xlu0 %v312_v23 }
 0x322   :  { %1195 = vpow2.f32 %v310_v22 }
 0x328   :  { %v1568_v24 = vpop.eup %1195 }
 0x329   :  { %v315_v25 = vsel %vm256_vm9, %v1568_v24, 0.0 }
 0x32a   :  { %316 = vadd.xlane.f32.xlu2 %v315_v25 }
 0x32c   :  { %v411_v26 = vpop.xlane.xlu0 %410 }
 0x32d   :  { %v415_v27 = vsub.f32 %v383_v51, %v411_v26 }
 0x32f   :  { %v417_v28 = vmul.f32 1.442695, %v415_v27 }
 0x331   :  { %1197 = vpow2.f32 %v417_v28 }
 0x334   :  { %v414_v29 = vpop.xlane.xlu2 %413 }
 0x335   :  { %551 = vrot.lane.b32.xlu0 %v1558_v6, %s1351_s21  ;;  %v416_v36 = vsub.f32 %v406_v55, %v414_v29 }
 0x337   :  { %v1574_v30 = vpop.eup %1197  ;;  %v419_v38 = vmul.f32 1.442695, %v416_v36 }
 0x338   :  { %v421_v31 = vsel %vm256_vm9, %v1574_v30, 0.0 }
 0x339   :  { %422 = vadd.xlane.f32.xlu1 %v421_v31  ;;  %1199 = vpow2.f32 %v419_v38 }
 0x33c   :  { %v437_v33 = vpop.permute.xlu2 %436  ;;  %v529_v37 = vpop.xlane.xlu1 %528 }
 0x33d   :  { %v442_v34 = vsel %vm327_vm8, %v437_v33, 0  ;;  %v533_v39 = vsub.f32 %v501_v59, %v529_v37 }
 0x33e   :  { %451 = vmatpush.bf16.msrb.mxu0 %v442_v34 }
 0x33f   :  { %v535_v41 = vmul.f32 1.442695, %v533_v39  ;;  %v1200_v44 = vpop.eup %1199 }
 0x340   :  { %v424_v46 = vsel %vm256_vm9, %v1200_v44, 0.0 }
 0x341   :  { %1201 = vpow2.f32 %v535_v41 }
 0x342   :  { %572 = vrot.lane.b32.xlu2 %v459_v35, %s1351_s21 }
 0x344   :  { %v532_v43 = vpop.xlane.xlu0 %531 }
 0x345   :  { %v534_v16 = vsub.f32 %v524_v63, %v532_v43 }
 0x347   :  { %v537_v47 = vmul.f32 1.442695, %v534_v16  ;;  %v1202_v48 = vpop.eup %1201 }
 0x348   :  { %v539_v49 = vsel %vm256_vm9, %v1202_v48, 0.0 }
 0x352   :  { %460 = vrot.lane.b32.xlu1 %v459_v35, %s1353_s2 }
 0x354   :  { %v644_v40 = vpop.xlane.xlu1 %643 }
 0x355   :  { %v646_v42 = vsub.f32 %v636_v9, %v644_v40 }
 0x357   :  { %v649_v45 = vmul.f32 1.442695, %v646_v42 }
 0x359   :  { %1203 = vpow2.f32 %v649_v45 }
 0x35a   :  { %1205 = vpow2.f32 %v537_v47 }
 0x35f   :  { %425 = vadd.xlane.f32.xlu0 %v424_v46  ;;  %v1584_v50 = vpop.eup %1203 }
 0x360   :  { %v654_v51 = vsel %vm256_vm9, %v1584_v50, 0.0  ;;  %v1206_v52 = vpop.eup %1205 }
 0x361   :  { %v542_v53 = vsel %vm256_vm9, %v1206_v52, 0.0 }
 0x367   :  { %540 = vadd.xlane.f32.xlu0 %v539_v49 }
 0x36b   :  { %655 = vadd.xlane.f32.xlu2 %v654_v51 }
 0x36f   :  { %543 = vadd.xlane.f32.xlu0 %v542_v53 }
 0x375   :  { %v641_v54 = vpop.xlane.xlu2 %640 }
 0x376   :  { %v645_v55 = vsub.f32 %v613_v14, %v641_v54 }
 0x378   :  { %v647_v56 = vmul.f32 1.442695, %v645_v55 }
 0x37a   :  { %1207 = vpow2.f32 %v647_v56 }
 0x380   :  { %v1208_v57 = vpop.eup %1207 }
 0x381   :  { %v651_v58 = vsel %vm256_vm9, %v1208_v57, 0.0 }
 0x382   :  { %652 = vadd.xlane.f32.xlu1 %v651_v58 }
 0x383   :  { %663 = vrot.lane.b32.xlu0 %v1558_v6, %s1354_s23 }
 0x38b   :  { %684 = vrot.lane.b32.xlu0 %v459_v35, %s1354_s23 }
 0x394   :  { %v314_v59 = vpop.xlane.xlu0 %313 }
 0x395   :  { %1209 = vrcp.f32 %v314_v59  ;;  %v1131_v59 = vld [vmem:[%s1700_s9 + $0x8] sm:$0xff] }
 0x396   :  { %767 = vmatpush.bf16.msra.mxu2 %v1131_v59 }
 0x39b   :  { %v1210_v60 = vpop.eup %1209 }
 0x39c   :  { %v320_v61 = vmul.f32 %v1210_v60, %v1564_v21  ;;  %v1130_v60 = vld [vmem:[%s1700_s9] sm:$0xff] }
 0x39d   :  { %v317_v62 = vpop.xlane.xlu2 %316  ;;  %768 = vmatpush.bf16.msra.mxu2 %v1130_v60 }
 0x39e   :  { %1211 = vrcp.f32 %v317_v62  ;;  %v322_v63 = vpack.c.bf16 %v320_v61, %v320_v61 }
 0x3a0   :  { %1060 = vmatmul.msk.bf16.vlgmr.msra.gmra.mxu0 %vm256_vm9, %v322_v63 }
 0x3a4   :  { %v1212_v1 = vpop.eup %1211 }
 0x3a5   :  { %v321_v3 = vmul.f32 %v1212_v1, %v1568_v24  ;;  %v573_v13 = vpop.permute.xlu2 %572 }
 0x3a6   :  { %v578_v17 = vsel %vm327_vm8, %v573_v13, 0 }
 0x3a7   :  { %v323_v4 = vpack.c.bf16 %v321_v3, %v321_v3  ;;  %v552_v5 = vpop.permute.xlu0 %551 }
 0x3a8   :  { %v557_v7 = vsel %vm327_vm8, %v552_v5, 0 }
 0x3a9   :  { %1061 = vmatmul.msk.bf16.vlgmr.msra.gmra.mxu1 %vm256_vm9, %v323_v4  ;;  %566 = vmatpush.bf16.msra.mxu0 %v557_v7 }
 0x3ac   :  { %v423_v6 = vpop.xlane.xlu1 %422 }
 0x3ad   :  { %1213 = vrcp.f32 %v423_v6 }
 0x3b3   :  { %v1214_v8 = vpop.eup %1213 }
 0x3b4   :  { %v429_v9 = vmul.f32 %v1214_v8, %v1574_v30 }
 0x3b6   :  { %v431_v11 = vpack.c.bf16 %v429_v9, %v429_v9 }
 0x3b8   :  { %1064 = vmatmul.msk.bf16.vlgmr.msrb.gmra.mxu0 %vm256_vm9, %v431_v11 }
 0x3c4   :  { %v461_v14 = vpop.permute.xlu1 %460 }
 0x3c5   :  { %v466_v15 = vsel %vm327_vm8, %v461_v14, 0 }
 0x3c6   :  { %475 = vmatpush.bf16.msrb.mxu1 %v466_v15 }
 0x3ca   :  { %587 = vmatpush.bf16.msra.mxu1 %v578_v17 }
 0x3d2   :  { %v426_v12 = vpop.xlane.xlu0 %425 }
 0x3d3   :  { %1215 = vrcp.f32 %v426_v12  ;;  %v1182_v12 = vld [vmem:[%s1701_s10] ss:$0 sm:$0xff]  ;;  %s1358_s10 = smov 128  }
 0x3d9   :  { %v1216_v18 = vpop.eup %1215 }
 0x3da   :  { %v430_v19 = vmul.f32 %v1216_v18, %v1200_v44  ;;  %v541_v20 = vpop.xlane.xlu0 %540 }
 0x3db   :  { %1217 = vrcp.f32 %v541_v20 }
 0x3dc   :  { %v432_v21 = vpack.c.bf16 %v430_v19, %v430_v19 }
 0x3de   :  { %1065 = vmatmul.msk.bf16.vlgmr.msrb.gmra.mxu1 %vm256_vm9, %v432_v21  ;;  %v656_v29 = vpop.xlane.xlu2 %655 }
 0x3e1   :  { %v1218_v22 = vpop.eup %1217 }
 0x3e2   :  { %v547_v23 = vmul.f32 %v1218_v22, %v1202_v48  ;;  %v544_v24 = vpop.xlane.xlu0 %543 }
 0x3e3   :  { %1219 = vrcp.f32 %v544_v24 }
 0x3e4   :  { %v549_v25 = vpack.c.bf16 %v547_v23, %v547_v23  ;;  %1221 = vrcp.f32 %v656_v29 }
 0x3e6   :  { %1068 = vmatmul.msk.bf16.vlgmr.msra.gmra.mxu0 %vm256_vm9, %v549_v25 }
 0x3e9   :  { %v1220_v26 = vpop.eup %1219 }
 0x3ea   :  { %v548_v27 = vmul.f32 %v1220_v26, %v1206_v52  ;;  %v1222_v33 = vpop.eup %1221 }
 0x3eb   :  { %v660_v35 = vmul.f32 %v1222_v33, %v1584_v50 }
 0x3ec   :  { %v550_v28 = vpack.c.bf16 %v548_v27, %v548_v27 }
 0x3ed   :  { %v662_v40 = vpack.c.bf16 %v660_v35, %v660_v35 }
 0x3ee   :  { %1069 = vmatmul.msk.bf16.vlgmr.msra.gmra.mxu1 %vm256_vm9, %v550_v28 }
 0x3f5   :  { %v664_v30 = vpop.permute.xlu0 %663  ;;  %v653_v31 = vpop.xlane.xlu1 %652 }
 0x3f6   :  { %v669_v32 = vsel %vm327_vm8, %v664_v30, 0  ;;  %1223 = vrcp.f32 %v653_v31 }
 0x3f7   :  { %678 = vmatpush.bf16.msrb.mxu0 %v669_v32 }
 0x3fc   :  { %v1224_v34 = vpop.eup %1223 }
 0x3fd   :  { %v659_v36 = vmul.f32 %v1224_v34, %v1208_v57  ;;  %v685_v37 = vpop.permute.xlu0 %684  ;;  %v1133_v34 = vld [vmem:[#allocation5 + $0x8] sm:$0xff] }
 0x3fe   :  { %v690_v38 = vsel %vm327_vm8, %v685_v37, 0  ;;  %863 = vmatpush.bf16.msra.mxu3 %v1133_v34 }
 0x3ff   :  { %v661_v39 = vpack.c.bf16 %v659_v36, %v659_v36  ;;  %699 = vmatpush.bf16.msrb.mxu1 %v690_v38  ;;  %v1132_v38 = vld [vmem:[#allocation5] sm:$0xff] }
 0x401   :  { %1072 = vmatmul.msk.bf16.vlgmr.msrb.gmra.mxu0 %vm256_vm9, %v661_v39 }
 0x402   :  { %1073 = vmatmul.msk.bf16.vlgmr.msrb.gmra.mxu1 %vm256_vm9, %v662_v40  ;;  %864 = vmatpush.bf16.msra.mxu3 %v1132_v38 }
 0x41d   :  { %v340_v41 = vpop.f32.mrf.mxu0 }
 0x425   :  { %v342_v42 = vpop.f32.mrf.mxu0 }
 0x426   :  { %v359_v43 = vpop.f32.mrf.mxu1 }
 0x42e   :  { %v361_v44 = vpop.f32.mrf.mxu1 }
 0x435   :  { %v453_v16 = vpop.f32.mrf.mxu0 }
 0x43d   :  { %v455_v45 = vpop.f32.mrf.mxu0 }
 0x45b   :  { %v477_v46 = vpop.f32.mrf.mxu1 }
 0x45c   :  { %v1161_v47 = vpack.i.bf16 %v477_v46, %v453_v16 }
 0x45e   :  { %1162 = vrot.lane.b32.xlu0 %v1161_v47, %s1355_s24 }
 0x463   :  { %v479_v48 = vpop.f32.mrf.mxu1  ;;  %v568_v49 = vpop.f32.mrf.mxu0 }
 0x46b   :  { %v570_v50 = vpop.f32.mrf.mxu0  ;;  %v589_v51 = vpop.f32.mrf.mxu1 }
 0x46c   :  { %v1166_v52 = vpack.i.bf16 %v589_v51, %v568_v49 }
 0x46e   :  { %1167 = vrot.lane.b32.xlu0 %v1166_v52, %s1342_s22  ;;  %s1021_s22 = sshll.u32 %s1709_s18, 4  ;;  %s1008_s18 = sshll.u32 %s1708_s17, 4  ;;  %s1022_s22 = int_to_ptr.hbm [resolvable:$true] %s1021_s22  ;;  %s1009_s18 = int_to_ptr.hbm [resolvable:$true] %s1008_s18 }
 0x473   :  { %v591_v53 = vpop.f32.mrf.mxu1 }
 0x47e   :  { %v680_v54 = vpop.f32.mrf.mxu0 }
 0x47f   :  { %v701_v55 = vpop.f32.mrf.mxu1 }
 0x480   :  { %v1171_v56 = vpack.i.bf16 %v701_v55, %v680_v54 }
 0x482   :  { %1172 = vrot.lane.b32.xlu1 %v1171_v56, %s1356_s5  ;;  %v1184_v56 = vld [vmem:[%s1703_s12] ss:$0 sm:$0xff] }
 0x486   :  { %v682_v57 = vpop.f32.mrf.mxu0 }
 0x487   :  { %v703_v58 = vpop.f32.mrf.mxu1 }
 0x4d0   :  { %v1163_v61 = vpop.permute.xlu0 %1162 }
 0x4d1   :  { %v1165_v63 = vunpack.i.h.bf16 %v1163_v61  ;;  %v1164_v1 = vunpack.i.l.bf16 %v1163_v61 }
 0x4d3   :  { %v730_v7 = vsel %vm256_vm9, %v359_v43, %v1165_v63  ;;  %v729_v6 = vsel %vm256_vm9, %v340_v41, %v1164_v1  ;;  %v1141_v63 = vld [vmem:[%s1706_s15 + $0x38] sm:$0xff]  ;;  %v1140_v1 = vld [vmem:[%s1706_s15 + $0x30] sm:$0xff] }
 0x4d4   :  { %982 = vmatpush.bf16.msra.mxu0 %v1141_v63 }
 0x4d8   :  { %983 = vmatpush.bf16.msra.mxu0 %v1140_v1 }
 0x4e0   :  { %v1168_v62 = vpop.permute.xlu0 %1167 }
 0x4e1   :  { %v1170_v3 = vunpack.i.h.bf16 %v1168_v62  ;;  %v1169_v4 = vunpack.i.l.bf16 %v1168_v62 }
 0x4e3   :  { %v733_v11 = vsel %vm731_vm10, %v730_v7, %v1170_v3  ;;  %v732_v13 = vsel %vm731_vm10, %v729_v6, %v1169_v4  ;;  %v1139_v3 = vld [vmem:[%s1706_s15 + $0x28] sm:$0xff]  ;;  %v1138_v4 = vld [vmem:[%s1706_s15 + $0x20] sm:$0xff]  ;;  %v1137_v7 = vld [vmem:[%s1706_s15 + $0x18] sm:$0xff] }
 0x4e4   :  { %984 = vmatpush.bf16.msra.mxu0 %v1139_v3 }
 0x4e8   :  { %985 = vmatpush.bf16.msra.mxu0 %v1138_v4 }
 0x4ec   :  { %986 = vmatpush.bf16.msra.mxu0 %v1137_v7 }
 0x4f4   :  { %v1173_v5 = vpop.permute.xlu1 %1172 }
 0x4f5   :  { %v1175_v8 = vunpack.i.h.bf16 %v1173_v5  ;;  %v1174_v9 = vunpack.i.l.bf16 %v1173_v5  ;;  %v1185_v5 = vld [vmem:[%s1705_s14] ss:$0 sm:$0xff] }
 0x4f7   :  { %v736_v14 = vsel %vm734_vm11, %v733_v11, %v1175_v8  ;;  %v735_v15 = vsel %vm734_vm11, %v732_v13, %v1174_v9  ;;  %v1136_v9 = vld [vmem:[%s1706_s15 + $0x10] sm:$0xff] }
 0x4f8   :  { %v737_v17 = vpack.c.bf16 %v736_v14, %v735_v15  ;;  %987 = vmatpush.bf16.msra.mxu0 %v1136_v9  ;;  %v1135_v14 = vld [vmem:[%s1706_s15 + $0x8] sm:$0xff] }
 0x4fa   :  { %1082 = vmatmul.msk.bf16.vlgmr.msra.gmra.mxu2 %vm97_vm0, %v737_v17 }
 0x4fc   :  { %988 = vmatpush.bf16.msra.mxu0 %v1135_v14 }
 0x57d   :  { %v770_v18 = vpop.f32.mrf.mxu2 }
 0x57e   :  { %v771_v19 = vadd.f32 %v1182_v12, %v770_v18 }
 0x580   :  { %v1625_v20 = vadd.f32 %v771_v19, %v1466_v0 }
 0x582   :  { %v779_v21 = vsel %vm97_vm0, %v1625_v20, 0.0 }
 0x583   :  { %780 = vadd.xlane.f32.xlu0 %v779_v21 }
 0x585   :  { %v772_v22 = vpop.f32.mrf.mxu2 }
 0x586   :  { %v773_v23 = vadd.f32 %v1182_v12, %v772_v22  ;;  %v1134_v12 = vld [vmem:[%s1706_s15] sm:$0xff]  ;;  %s1357_s15 = smov [#allocation8]  }
 0x587   :  { %989 = vmatpush.bf16.msra.mxu0 %v1134_v12  ;;  %s1019_s26 = sshll.u32 %s1357_s15, 4  ;;  %s1020_s26 = int_to_ptr.vmem [resolvable:$true] %s1019_s26 }
 0x588   :  { %v1630_v24 = vadd.f32 %v773_v23, %v1473_v2  ;;  %1027 = dma.vmem_to_hbm [thread:$0]  %s1020_s26, 256, %s1022_s22, [#allocation9], %s1358_s10, %s1358_s10, %s1355_s24  }
 0x58a   :  { %v782_v25 = vsel %vm97_vm0, %v1630_v24, 0.0 }
 0x58b   :  { %783 = vadd.xlane.f32.xlu2 %v782_v25 }
 0x5f6   :  { %v781_v26 = vpop.xlane.xlu0 %780 }
 0x5f7   :  { %v785_v27 = vmul.f32 %v781_v26, %v1477_v10 }
 0x5f9   :  { %v787_v28 = vsub.f32 %v1625_v20, %v785_v27 }
 0x5fb   :  { %v789_v0 = vmul.f32 %v787_v28, %v787_v28 }
 0x5fd   :  { %v791_v29 = vsel %vm97_vm0, %v789_v0, 0.0 }
 0x5fe   :  { %v784_v30 = vpop.xlane.xlu2 %783  ;;  %792 = vadd.xlane.f32.xlu2 %v791_v29 }
 0x5ff   :  { %v786_v31 = vmul.f32 %v784_v30, %v1477_v10 }
 0x601   :  { %v788_v32 = vsub.f32 %v1630_v24, %v786_v31 }
 0x603   :  { %v790_v2 = vmul.f32 %v788_v32, %v788_v32 }
 0x605   :  { %v794_v33 = vsel %vm97_vm0, %v790_v2, 0.0 }
 0x606   :  { %795 = vadd.xlane.f32.xlu2 %v794_v33 }
 0x671   :  { %v793_v35 = vpop.xlane.xlu2 %792 }
 0x672   :  { %v797_v36 = vmul.f32 %v793_v35, %v1477_v10 }
 0x674   :  { %v799_v37 = vadd.f32 1e-05, %v797_v36 }
 0x676   :  { %1225 = vrsqrt.f32 %v799_v37  ;;  %vm807_vm13 = vweird.f32 %v799_v37 }
 0x679   :  { %v796_v39 = vpop.xlane.xlu2 %795 }
 0x67a   :  { %v798_v40 = vmul.f32 %v796_v39, %v1477_v10  ;;  %v1183_v10 = vld [vmem:[%s1702_s11] ss:$0 sm:$0xff] }
 0x67c   :  { %v1226_v41 = vpop.eup %1225  ;;  %v800_v42 = vadd.f32 1e-05, %v798_v40 }
 0x67d   :  { %v802_v43 = vmul.f32 %v1226_v41, %v799_v37  ;;  %vm808_vm12 = vweird.f32 %v1226_v41 }
 0x67e   :  { %1227 = vrsqrt.f32 %v800_v42  ;;  %vm809_vm14 = vmor %vm807_vm13, %vm808_vm12  ;;  %vm817_vm1 = vweird.f32 %v800_v42 }
 0x67f   :  { %v803_v44 = vmul.f32 %v1226_v41, %v802_v43 }
 0x681   :  { %v804_v16 = vmul.f32 0.5, %v803_v44 }
 0x683   :  { %v805_v45 = vsub.f32 1.5, %v804_v16 }
 0x684   :  { %v1228_v46 = vpop.eup %1227 }
 0x685   :  { %v806_v47 = vmul.f32 %v1226_v41, %v805_v45  ;;  %v812_v48 = vmul.f32 %v1228_v46, %v800_v42  ;;  %vm818_vm15 = vweird.f32 %v1228_v46 }
 0x686   :  { %vm819_vm2 = vmor %vm817_vm1, %vm818_vm15 }
 0x687   :  { %v813_v49 = vmul.f32 %v1228_v46, %v812_v48  ;;  %v810_v50 = vsel %vm809_vm14, %v1226_v41, %v806_v47 }
 0x688   :  { %v821_v53 = vmul.f32 %v810_v50, %v787_v28 }
 0x689   :  { %v814_v51 = vmul.f32 0.5, %v813_v49 }
 0x68a   :  { %v826_v57 = vmul.f32 %v1183_v10, %v821_v53 }
 0x68b   :  { %v815_v52 = vsub.f32 1.5, %v814_v51 }
 0x68c   :  { %v831_v60 = vadd.f32 %v1184_v56, %v826_v57 }
 0x68d   :  { %v816_v54 = vmul.f32 %v1228_v46, %v815_v52 }
 0x68f   :  { %v820_v55 = vsel %vm819_vm2, %v1228_v46, %v816_v54  ;;  %v1186_v46 = vld [vmem:[%s1707_s16] ss:$0 sm:$0xff] }
 0x690   :  { %v822_v58 = vmul.f32 %v820_v55, %v788_v32 }
 0x692   :  { %v827_v59 = vmul.f32 %v1183_v10, %v822_v58 }
 0x694   :  { %v832_v61 = vadd.f32 %v1184_v56, %v827_v59 }
 0x696   :  { %v833_v62 = vpack.c.bf16 %v832_v61, %v831_v60 }
 0x698   :  { %1091 = vmatmul.msk.bf16.vlgmr.msra.gmra.mxu3 %vm97_vm0, %v833_v62 }
 0x71b   :  { %v866_v6 = vpop.f32.mrf.mxu3 }
 0x71c   :  { %v867_v8 = vadd.f32 %v1185_v5, %v866_v6 }
 0x71e   :  { %v1092_v11 = vmul.f32 -1.702, %v867_v8 }
 0x720   :  { %v875_v13 = vmul.f32 1.442695, %v1092_v11 }
 0x722   :  { %1229 = vpow2.f32 %v875_v13 }
 0x723   :  { %v868_v15 = vpop.f32.mrf.mxu3 }
 0x724   :  { %v869_v17 = vadd.f32 %v1185_v5, %v868_v15 }
 0x726   :  { %v1093_v18 = vmul.f32 -1.702, %v869_v17 }
 0x728   :  { %v1230_v19 = vpop.eup %1229  ;;  %v877_v21 = vmul.f32 1.442695, %v1093_v18 }
 0x729   :  { %v879_v22 = vadd.f32 1.0, %v1230_v19 }
 0x72a   :  { %1231 = vpow2.f32 %v877_v21 }
 0x72b   :  { %1233 = vrcp.f32 %v879_v22  ;;  %v892_v32 = vand.u32 2147483648, %v879_v22  ;;  %vm886_vm4 = vweird.f32 %v879_v22  ;;  %v890_v2 = vand.u32 2147483647, %v879_v22 }
 0x72d   :  { %v893_v38 = vor.u32 1.1754944e-38, %v892_v32  ;;  %vm891_vm7 = vcmp.eq.f32.partialorder %v890_v2, 8.507059e+37 }
 0x730   :  { %v1232_v23 = vpop.eup %1231 }
 0x731   :  { %v1234_v25 = vpop.eup %1233  ;;  %v880_v26 = vadd.f32 1.0, %v1232_v23 }
 0x732   :  { %v882_v27 = vmul.f32 %v1234_v25, %v879_v22  ;;  %vm887_vm3 = vweird.f32 %v1234_v25 }
 0x733   :  { %1235 = vrcp.f32 %v880_v26  ;;  %vm888_vm5 = vmor %vm886_vm4, %vm887_vm3  ;;  %v907_v34 = vand.u32 2147483648, %v880_v26  ;;  %v905_v37 = vand.u32 2147483647, %v880_v26  ;;  %vm901_vm8 = vweird.f32 %v880_v26 }
 0x734   :  { %v883_v28 = vsub.f32 1.0, %v882_v27 }
 0x735   :  { %v908_v41 = vor.u32 1.1754944e-38, %v907_v34  ;;  %vm906_vm10 = vcmp.eq.f32.partialorder %v905_v37, 8.507059e+37 }
 0x736   :  { %v884_v0 = vmul.f32 %v1234_v25, %v883_v28 }
 0x738   :  { %v885_v30 = vadd.f32 %v1234_v25, %v884_v0 }
 0x739   :  { %v1236_v29 = vpop.eup %1235 }
 0x73a   :  { %v897_v31 = vmul.f32 %v1236_v29, %v880_v26  ;;  %v889_v35 = vsel %vm888_vm5, %v1234_v25, %v885_v30  ;;  %vm902_vm6 = vweird.f32 %v1236_v29 }
 0x73b   :  { %v894_v40 = vsel %vm891_vm7, %v893_v38, %v889_v35  ;;  %vm903_vm9 = vmor %vm901_vm8, %vm902_vm6 }
 0x73c   :  { %v898_v33 = vsub.f32 1.0, %v897_v31  ;;  %v911_v44 = vmul.f32 %v894_v40, %v867_v8 }
 0x73e   :  { %v899_v36 = vmul.f32 %v1236_v29, %v898_v33 }
 0x740   :  { %v900_v39 = vadd.f32 %v1236_v29, %v899_v36 }
 0x742   :  { %v904_v42 = vsel %vm903_vm9, %v1236_v29, %v900_v39 }
 0x743   :  { %v909_v43 = vsel %vm906_vm10, %v908_v41, %v904_v42 }
 0x744   :  { %v912_v16 = vmul.f32 %v909_v43, %v869_v17 }
 0x746   :  { %v913_v45 = vpack.c.bf16 %v912_v16, %v911_v44 }
 0x748   :  { %990 = vmatmul.bf16.vlgmr.msra.gmra.mxu0 %v913_v45 }
 0x7c5   :  { %v991_v47 = vpop.f32.mrf.mxu0 }
 0x7c6   :  { %v992_v48 = vadd.f32 %v1186_v46, %v991_v47 }
 0x7c8   :  { %v996_v49 = vadd.f32 %v992_v48, %v1625_v20 }
 0x7ca   :  { %998 = vst.msk [vmem:[#allocation7] sm:$0xff] %vm97_vm0, %v996_v49 }
 0x7cd   :  { %v993_v50 = vpop.f32.mrf.mxu0 }
 0x7ce   :  { %v994_v51 = vadd.f32 %v1186_v46, %v993_v50 }
 0x7d0   :  { %v997_v52 = vadd.f32 %v994_v51, %v1630_v24 }
 0x7d2   :  { %999 = vst.msk [vmem:[#allocation7 + $0x8] sm:$0xff] %vm97_vm0, %v997_v52 }
 0x7d3   :  { %1014 = dma.vmem_to_hbm [thread:$0]  %s1007_s29, 256, %s1009_s18, [#allocation4], %s1358_s10, %s1358_s10, %s1355_s24  }
 0x7d4   :  { %1337 = dma.done.wait [#allocation4], 256  }
 0x7d5   :  { %1338 = vsyncadd [#allocation4], 4294967040 }
 0x7d6   :  { %1339 = dma.done.wait [#allocation9], 256  }
 0x7d7   :  { %1340 = vsyncadd [#allocation9], 4294967040 }
 0x7d8   :  { %1036 = vsyncpa [#allocation3], 1 }
 0x7d9   :  { %1037 = vsyncpa [#allocation6], 1 }
 0x7da   :  { %1038 = vsyncpa [#allocation4], 1 }
 0x7db   :  { %1039 = vsyncpa [#allocation9], 1 }

</bundles_post_ra>
